<compile_context>
chip_gen: v7x
topology: tpu7x:2x2x1
jax: 0.10.0
libtpu: 0.0.40
codegen_flags: <defaults>
</compile_context>

<pallas_src>
import jax
import jax.numpy as jnp
from jax.experimental import pallas as pl
from jax.experimental.pallas import tpu as pltpu


HIDDEN = 256
LEAKY_SLOPE = 0.2  # nn.LeakyReLU(0.2) in the reference Encoder


def _round_up(x, m):
    return ((x + m - 1) // m) * m


# ----------------------------------------------------------------------------
# Fused kernel: two 4-layer encoders + shared 2-layer head.
#   anchor branch : h = LReLU(x@W1a+b0); LReLU(@Ws[0]+b1); LReLU(@Ws[1]+b2); @Ws[2]+b3
#   positive branch: same with W1p / Ws[3..5] / b4..b7
#   shared head    : on concat(rows): ReLU(@Ws[6]+b8); @Ws[7]+b9
# ----------------------------------------------------------------------------
def _tabmap_kernel(a_ref, p_ref, w1a_ref, w1p_ref, ws_ref, bs_ref,
                   oa_ref, op_ref):
    f32 = jnp.float32
    bf16 = jnp.bfloat16

    bs = bs_ref[...].astype(f32)          # (10, HIDDEN), loaded once

    def bias(i):                          # (1, HIDDEN) f32 row
        return bs[i:i + 1, :]

    def dot(h, w):                        # bf16 MXU matmul, f32 accumulate
        return jnp.dot(h.astype(bf16), w.astype(bf16),
                       preferred_element_type=f32)

    def leaky(h):                         # elementwise in f32 (VPU)
        return jnp.where(h > 0, h, LEAKY_SLOPE * h)

    # --- encoder branch 1 (anchor) -------------------------------------
    ha = a_ref[...].astype(f32)
    ha = leaky(dot(ha, w1a_ref[...]) + bias(0))
    ha = leaky(dot(ha, ws_ref[0]) + bias(1))
    ha = leaky(dot(ha, ws_ref[1]) + bias(2))
    ha = dot(ha, ws_ref[2]) + bias(3)

    # --- encoder branch 2 (positive) ------------------------------------
    hp = p_ref[...].astype(f32)
    hp = leaky(dot(hp, w1p_ref[...]) + bias(4))
    hp = leaky(dot(hp, ws_ref[3]) + bias(5))
    hp = leaky(dot(hp, ws_ref[4]) + bias(6))
    hp = dot(hp, ws_ref[5]) + bias(7)

    # --- shared pretraining head on concatenated rows (M = 2*tile) ------
    h = jnp.concatenate([ha, hp], axis=0)
    h = jnp.maximum(dot(h, ws_ref[6]) + bias(8), 0.0)
    h = dot(h, ws_ref[7]) + bias(9)

    tb = oa_ref.shape[0]
    oa_ref[...] = h[:tb].astype(oa_ref.dtype)
    op_ref[...] = h[tb:].astype(op_ref.dtype)


def tabmap_forward(anchor, positive, w1a, w1p, w_stack, b_stack,
                   *, batch_tile=256, out_dtype=jnp.float32):
    """Fused TabMap forward.

    anchor:   (B, input_dim)   f32
    positive: (B, anchor_len)  f32
    w1a:      (input_dim, H)   bf16
    w1p:      (anchor_len, H)  bf16
    w_stack:  (8, H, H)        bf16  [enc1..3, enc2_1..3, head0, head1]
    b_stack:  (10, H)          f32   [enc b0..3, enc2 b0..3, head b0..1]
    """
    B, d_in = anchor.shape
    d_pos = positive.shape[1]
    H = w_stack.shape[-1]

    # Batch tile: multiple of 8 (sublane), capped so per-step VMEM stays a few
    # MB (sized for v7x's 64 MiB VMEM with plenty of headroom).
    tb = min(batch_tile, _round_up(B, 8))
    Bp = _round_up(B, tb)
    if Bp != B:
        pad = Bp - B
        anchor = jnp.pad(anchor, ((0, pad), (0, 0)))
        positive = jnp.pad(positive, ((0, pad), (0, 0)))

    batch_spec = lambda d: pl.BlockSpec((tb, d), lambda i: (i, 0))
    full2 = lambda a: pl.BlockSpec(a.shape, lambda i: (0, 0))
    full3 = lambda a: pl.BlockSpec(a.shape, lambda i: (0, 0, 0))

    out_a, out_p = pl.pallas_call(
        _tabmap_kernel,
        out_shape=(jax.ShapeDtypeStruct((Bp, H), out_dtype),
                   jax.ShapeDtypeStruct((Bp, H), out_dtype)),
        grid_spec=pltpu.PrefetchScalarGridSpec(
            num_scalar_prefetch=0,
            grid=(Bp // tb,),
            in_specs=[batch_spec(d_in), batch_spec(d_pos),
                      full2(w1a), full2(w1p), full3(w_stack), full2(b_stack)],
            out_specs=[batch_spec(H), batch_spec(H)],
        ),
        compiler_params=pltpu.CompilerParams(
            dimension_semantics=("parallel",)),
    )(anchor, positive, w1a, w1p, w_stack, b_stack)

    if Bp != B:
        out_a, out_p = out_a[:B], out_p[:B]
    return out_a, out_p


# ----------------------------------------------------------------------------
# Parameter construction (mirrors the PyTorch module __init__).
# nn.Linear weight is (out, in); we store the transpose (in, out).
# Xavier-uniform weights, biases filled with 0.01.
# ----------------------------------------------------------------------------
def _xavier_uniform(key, fan_in, fan_out):
    bound = jnp.sqrt(6.0 / (fan_in + fan_out))
    return jax.random.uniform(key, (fan_in, fan_out), jnp.float32, -bound, bound)


def make_mlp_params(key, dims):
    ws, bs = [], []
    for i in range(len(dims) - 1):
        key, sub = jax.random.split(key)
        ws.append(_xavier_uniform(sub, dims[i], dims[i + 1]))
        bs.append(jnp.full((1, dims[i + 1]), 0.01, jnp.float32))
    return ws, bs


class TabMapPallas:
    def __init__(self, input_dim, anchor_rate=0.5, hidden=HIDDEN, seed=0):
        self.input_dim = input_dim
        self.anchor_len = int(anchor_rate * input_dim)
        self.hidden = hidden
        key = jax.random.PRNGKey(seed)
        k_enc, k_enc2, k_head, self._sample_key = jax.random.split(key, 4)

        # Encoder(input_dim): 4 Linear layers, hidden_dim=[256,256,256,256]
        self.enc_w, self.enc_b = make_mlp_params(
            k_enc, [input_dim, hidden, hidden, hidden, hidden])
        # Encoder(anchor_len)
        self.enc2_w, self.enc2_b = make_mlp_params(
            k_enc2, [self.anchor_len, hidden, hidden, hidden, hidden])
        # g_head: 2 Linear layers 256 -> 256 -> 256
        self.head_w, self.head_b = make_mlp_params(k_head, [hidden, hidden, hidden])

        # Packed kernel operands: bf16 weights, f32 bias stack.
        self.w1a = self.enc_w[0].astype(jnp.bfloat16)
        self.w1p = self.enc2_w[0].astype(jnp.bfloat16)
        self.w_stack = jnp.stack(
            self.enc_w[1:] + self.enc2_w[1:] + self.head_w).astype(jnp.bfloat16)
        self.b_stack = jnp.concatenate(
            self.enc_b + self.enc2_b + self.head_b, axis=0)  # (10, hidden) f32

        self._call_count = 0

    def _make_positive(self, anchor, key):
        # Per-row random subset of columns (without replacement), sorted —
        # mirrors the per-row `sample(range(m), anchor_len)` + sort loop.
        # TODO(synk): the reference uses Python's host RNG (random.sample); we
        # use jax.random, which is statistically equivalent but not bit-matched.
        B, m = anchor.shape
        keys = jax.random.split(key, B)

        def row_idx(k):
            perm = jax.random.permutation(k, m)
            return jnp.sort(perm[: self.anchor_len])

        idx = jax.vmap(row_idx)(keys)                     # (B, anchor_len)
        return jnp.take_along_axis(anchor, idx, axis=1)   # (B, anchor_len)

    def __call__(self, anchor, key=None):
        if key is None:
            key = jax.random.fold_in(self._sample_key, self._call_count)
            self._call_count += 1
        positive = self._make_positive(anchor, key)
        emb_anchor, emb_positive = tabmap_forward(
            anchor, positive, self.w1a, self.w1p, self.w_stack, self.b_stack)
        return emb_anchor, emb_positive, positive


# ----------------------------------------------------------------------------
# Pure-JAX reference (same bf16-at-the-MXU / f32-accumulate recipe) for a
# numerical cross-check of the fused kernel.
# ----------------------------------------------------------------------------
def _ref_mlp(x, weights, biases, acts):
    h = x.astype(jnp.float32)
    for w, b, a in zip(weights, biases, acts):
        h = jnp.dot(h.astype(jnp.bfloat16), w.astype(jnp.bfloat16),
                    preferred_element_type=jnp.float32) + b
        if a == "leaky":
            h = jnp.where(h > 0, h, LEAKY_SLOPE * h)
        elif a == "relu":
            h = jnp.maximum(h, 0.0)
    return h


def _ref_forward(anchor, positive, model):
    enc_acts = ["leaky", "leaky", "leaky", "none"]
    head_acts = ["relu", "none"]
    ea = _ref_mlp(anchor, model.enc_w, model.enc_b, enc_acts)
    ea = _ref_mlp(ea, model.head_w, model.head_b, head_acts)
    ep = _ref_mlp(positive, model.enc2_w, model.enc2_b, enc_acts)
    ep = _ref_mlp(ep, model.head_w, model.head_b, head_acts)
    return ea, ep


if __name__ == "__main__":
    batch, input_dim = 8, 32
    model = TabMapPallas(input_dim=input_dim, anchor_rate=0.5, hidden=HIDDEN, seed=0)

    key = jax.random.PRNGKey(0)
    anchor = jax.random.normal(key, (batch, input_dim), jnp.float32)

    emb_anchor, emb_positive, positive = model(anchor, key=jax.random.PRNGKey(1))
    emb_anchor = jax.block_until_ready(emb_anchor)
    emb_positive = jax.block_until_ready(emb_positive)

    assert emb_anchor.shape == (batch, HIDDEN)
    assert emb_positive.shape == (batch, HIDDEN)

    # Cross-check the fused Pallas kernel against the plain-JAX reference
    # built from the same f32 parameters (same bf16-cast matmul recipe).
    ref_a, ref_p = _ref_forward(anchor, positive, model)
    assert jnp.allclose(emb_anchor, ref_a, atol=2e-3, rtol=2e-3)
    assert jnp.allclose(emb_positive, ref_p, atol=2e-3, rtol=2e-3)

    print("KERNEL_OK")
</pallas_src>

<mosaic_0001>
module attributes {stable_mosaic.version = 11 : i64} {
  func.func @_tabmap_kernel(%arg0: i32, %arg1: memref<8x32xf32, #tpu.memory_space<vmem>>, %arg2: memref<8x16xf32, #tpu.memory_space<vmem>>, %arg3: memref<32x256xbf16, #tpu.memory_space<vmem>>, %arg4: memref<16x256xbf16, #tpu.memory_space<vmem>>, %arg5: memref<8x256x256xbf16, #tpu.memory_space<vmem>>, %arg6: memref<10x256xf32, #tpu.memory_space<vmem>>, %arg7: memref<8x256xf32, #tpu.memory_space<vmem>>, %arg8: memref<8x256xf32, #tpu.memory_space<vmem>>) attributes {dimension_semantics = [#tpu.dimension_semantics<parallel>], iteration_bounds = array<i64: 1>, scalar_prefetch = 0 : i64, scratch_operands = 0 : i64, tpu.core_type = #tpu.core_type<tc>, window_params = [{transform_indices = @transform_0, window_bounds = array<i64: 8, 32>}, {transform_indices = @transform_1, window_bounds = array<i64: 8, 16>}, {pipeline_mode = #tpu.pipeline_mode<synchronous>, transform_indices = @transform_2, window_bounds = array<i64: 32, 256>}, {pipeline_mode = #tpu.pipeline_mode<synchronous>, transform_indices = @transform_3, window_bounds = array<i64: 16, 256>}, {pipeline_mode = #tpu.pipeline_mode<synchronous>, transform_indices = @transform_4, window_bounds = array<i64: 8, 256, 256>}, {pipeline_mode = #tpu.pipeline_mode<synchronous>, transform_indices = @transform_5, window_bounds = array<i64: 10, 256>}, {transform_indices = @transform_6, window_bounds = array<i64: 8, 256>}, {transform_indices = @transform_7, window_bounds = array<i64: 8, 256>}]} {
    %c0 = arith.constant 0 : index
    %c0_0 = arith.constant 0 : index
    %0 = vector.load %arg6[%c0, %c0_0] : memref<10x256xf32, #tpu.memory_space<vmem>>, vector<10x256xf32>
    %c0_1 = arith.constant 0 : index
    %c0_2 = arith.constant 0 : index
    %1 = vector.load %arg1[%c0_1, %c0_2] : memref<8x32xf32, #tpu.memory_space<vmem>>, vector<8x32xf32>
    %c0_3 = arith.constant 0 : index
    %c0_4 = arith.constant 0 : index
    %2 = vector.load %arg3[%c0_3, %c0_4] : memref<32x256xbf16, #tpu.memory_space<vmem>>, vector<32x256xbf16>
    %3 = arith.truncf %1 : vector<8x32xf32> to vector<8x32xbf16>
    %cst = arith.constant dense<0.000000e+00> : vector<8x256xf32>
    %4 = tpu.matmul %3, %2, %cst {dimension_numbers = #tpu.dot_dimension_numbers<[1], [0], [0], [1], [0, 0, 1, 1], [], []>} : vector<8x32xbf16>, vector<32x256xbf16>, vector<8x256xf32> -> vector<8x256xf32>
    %5 = vector.extract_strided_slice %0 {offsets = [0, 0], sizes = [1, 256], strides = [1, 1]} : vector<10x256xf32> to vector<1x256xf32>
    %6 = vector.broadcast %5 : vector<1x256xf32> to vector<8x256xf32>
    %7 = arith.addf %4, %6 : vector<8x256xf32>
    %cst_5 = arith.constant 0.000000e+00 : f32
    %8 = vector.broadcast %cst_5 : f32 to vector<8x256xf32>
    %9 = arith.cmpf ogt, %7, %8 : vector<8x256xf32>
    %cst_6 = arith.constant 2.000000e-01 : f32
    %10 = vector.broadcast %cst_6 : f32 to vector<8x256xf32>
    %11 = arith.mulf %10, %7 : vector<8x256xf32>
    %12 = arith.select %9, %7, %11 : vector<8x256xi1>, vector<8x256xf32>
    %c0_7 = arith.constant 0 : index
    %c0_8 = arith.constant 0 : index
    %c0_9 = arith.constant 0 : index
    %13 = vector.load %arg5[%c0_7, %c0_8, %c0_9] : memref<8x256x256xbf16, #tpu.memory_space<vmem>>, vector<1x256x256xbf16>
    %14 = vector.shape_cast %13 : vector<1x256x256xbf16> to vector<256x256xbf16>
    %15 = arith.truncf %12 : vector<8x256xf32> to vector<8x256xbf16>
    %cst_10 = arith.constant dense<0.000000e+00> : vector<8x256xf32>
    %16 = tpu.matmul %15, %14, %cst_10 {dimension_numbers = #tpu.dot_dimension_numbers<[1], [0], [0], [1], [0, 0, 1, 1], [], []>} : vector<8x256xbf16>, vector<256x256xbf16>, vector<8x256xf32> -> vector<8x256xf32>
    %17 = vector.extract_strided_slice %0 {offsets = [1, 0], sizes = [1, 256], strides = [1, 1]} : vector<10x256xf32> to vector<1x256xf32>
    %18 = vector.broadcast %17 : vector<1x256xf32> to vector<8x256xf32>
    %19 = arith.addf %16, %18 : vector<8x256xf32>
    %cst_11 = arith.constant 0.000000e+00 : f32
    %20 = vector.broadcast %cst_11 : f32 to vector<8x256xf32>
    %21 = arith.cmpf ogt, %19, %20 : vector<8x256xf32>
    %cst_12 = arith.constant 2.000000e-01 : f32
    %22 = vector.broadcast %cst_12 : f32 to vector<8x256xf32>
    %23 = arith.mulf %22, %19 : vector<8x256xf32>
    %24 = arith.select %21, %19, %23 : vector<8x256xi1>, vector<8x256xf32>
    %c1 = arith.constant 1 : index
    %c0_13 = arith.constant 0 : index
    %c0_14 = arith.constant 0 : index
    %25 = vector.load %arg5[%c1, %c0_13, %c0_14] : memref<8x256x256xbf16, #tpu.memory_space<vmem>>, vector<1x256x256xbf16>
    %26 = vector.shape_cast %25 : vector<1x256x256xbf16> to vector<256x256xbf16>
    %27 = arith.truncf %24 : vector<8x256xf32> to vector<8x256xbf16>
    %cst_15 = arith.constant dense<0.000000e+00> : vector<8x256xf32>
    %28 = tpu.matmul %27, %26, %cst_15 {dimension_numbers = #tpu.dot_dimension_numbers<[1], [0], [0], [1], [0, 0, 1, 1], [], []>} : vector<8x256xbf16>, vector<256x256xbf16>, vector<8x256xf32> -> vector<8x256xf32>
    %29 = vector.extract_strided_slice %0 {offsets = [2, 0], sizes = [1, 256], strides = [1, 1]} : vector<10x256xf32> to vector<1x256xf32>
    %30 = vector.broadcast %29 : vector<1x256xf32> to vector<8x256xf32>
    %31 = arith.addf %28, %30 : vector<8x256xf32>
    %cst_16 = arith.constant 0.000000e+00 : f32
    %32 = vector.broadcast %cst_16 : f32 to vector<8x256xf32>
    %33 = arith.cmpf ogt, %31, %32 : vector<8x256xf32>
    %cst_17 = arith.constant 2.000000e-01 : f32
    %34 = vector.broadcast %cst_17 : f32 to vector<8x256xf32>
    %35 = arith.mulf %34, %31 : vector<8x256xf32>
    %36 = arith.select %33, %31, %35 : vector<8x256xi1>, vector<8x256xf32>
    %c2 = arith.constant 2 : index
    %c0_18 = arith.constant 0 : index
    %c0_19 = arith.constant 0 : index
    %37 = vector.load %arg5[%c2, %c0_18, %c0_19] : memref<8x256x256xbf16, #tpu.memory_space<vmem>>, vector<1x256x256xbf16>
    %38 = vector.shape_cast %37 : vector<1x256x256xbf16> to vector<256x256xbf16>
    %39 = arith.truncf %36 : vector<8x256xf32> to vector<8x256xbf16>
    %cst_20 = arith.constant dense<0.000000e+00> : vector<8x256xf32>
    %40 = tpu.matmul %39, %38, %cst_20 {dimension_numbers = #tpu.dot_dimension_numbers<[1], [0], [0], [1], [0, 0, 1, 1], [], []>} : vector<8x256xbf16>, vector<256x256xbf16>, vector<8x256xf32> -> vector<8x256xf32>
    %41 = vector.extract_strided_slice %0 {offsets = [3, 0], sizes = [1, 256], strides = [1, 1]} : vector<10x256xf32> to vector<1x256xf32>
    %42 = vector.broadcast %41 : vector<1x256xf32> to vector<8x256xf32>
    %43 = arith.addf %40, %42 : vector<8x256xf32>
    %c0_21 = arith.constant 0 : index
    %c0_22 = arith.constant 0 : index
    %44 = vector.load %arg2[%c0_21, %c0_22] : memref<8x16xf32, #tpu.memory_space<vmem>>, vector<8x16xf32>
    %c0_23 = arith.constant 0 : index
    %c0_24 = arith.constant 0 : index
    %45 = vector.load %arg4[%c0_23, %c0_24] : memref<16x256xbf16, #tpu.memory_space<vmem>>, vector<16x256xbf16>
    %46 = arith.truncf %44 : vector<8x16xf32> to vector<8x16xbf16>
    %cst_25 = arith.constant dense<0.000000e+00> : vector<8x256xf32>
    %47 = tpu.matmul %46, %45, %cst_25 {dimension_numbers = #tpu.dot_dimension_numbers<[1], [0], [0], [1], [0, 0, 1, 1], [], []>} : vector<8x16xbf16>, vector<16x256xbf16>, vector<8x256xf32> -> vector<8x256xf32>
    %48 = vector.extract_strided_slice %0 {offsets = [4, 0], sizes = [1, 256], strides = [1, 1]} : vector<10x256xf32> to vector<1x256xf32>
    %49 = vector.broadcast %48 : vector<1x256xf32> to vector<8x256xf32>
    %50 = arith.addf %47, %49 : vector<8x256xf32>
    %cst_26 = arith.constant 0.000000e+00 : f32
    %51 = vector.broadcast %cst_26 : f32 to vector<8x256xf32>
    %52 = arith.cmpf ogt, %50, %51 : vector<8x256xf32>
    %cst_27 = arith.constant 2.000000e-01 : f32
    %53 = vector.broadcast %cst_27 : f32 to vector<8x256xf32>
    %54 = arith.mulf %53, %50 : vector<8x256xf32>
    %55 = arith.select %52, %50, %54 : vector<8x256xi1>, vector<8x256xf32>
    %c3 = arith.constant 3 : index
    %c0_28 = arith.constant 0 : index
    %c0_29 = arith.constant 0 : index
    %56 = vector.load %arg5[%c3, %c0_28, %c0_29] : memref<8x256x256xbf16, #tpu.memory_space<vmem>>, vector<1x256x256xbf16>
    %57 = vector.shape_cast %56 : vector<1x256x256xbf16> to vector<256x256xbf16>
    %58 = arith.truncf %55 : vector<8x256xf32> to vector<8x256xbf16>
    %cst_30 = arith.constant dense<0.000000e+00> : vector<8x256xf32>
    %59 = tpu.matmul %58, %57, %cst_30 {dimension_numbers = #tpu.dot_dimension_numbers<[1], [0], [0], [1], [0, 0, 1, 1], [], []>} : vector<8x256xbf16>, vector<256x256xbf16>, vector<8x256xf32> -> vector<8x256xf32>
    %60 = vector.extract_strided_slice %0 {offsets = [5, 0], sizes = [1, 256], strides = [1, 1]} : vector<10x256xf32> to vector<1x256xf32>
    %61 = vector.broadcast %60 : vector<1x256xf32> to vector<8x256xf32>
    %62 = arith.addf %59, %61 : vector<8x256xf32>
    %cst_31 = arith.constant 0.000000e+00 : f32
    %63 = vector.broadcast %cst_31 : f32 to vector<8x256xf32>
    %64 = arith.cmpf ogt, %62, %63 : vector<8x256xf32>
    %cst_32 = arith.constant 2.000000e-01 : f32
    %65 = vector.broadcast %cst_32 : f32 to vector<8x256xf32>
    %66 = arith.mulf %65, %62 : vector<8x256xf32>
    %67 = arith.select %64, %62, %66 : vector<8x256xi1>, vector<8x256xf32>
    %c4 = arith.constant 4 : index
    %c0_33 = arith.constant 0 : index
    %c0_34 = arith.constant 0 : index
    %68 = vector.load %arg5[%c4, %c0_33, %c0_34] : memref<8x256x256xbf16, #tpu.memory_space<vmem>>, vector<1x256x256xbf16>
    %69 = vector.shape_cast %68 : vector<1x256x256xbf16> to vector<256x256xbf16>
    %70 = arith.truncf %67 : vector<8x256xf32> to vector<8x256xbf16>
    %cst_35 = arith.constant dense<0.000000e+00> : vector<8x256xf32>
    %71 = tpu.matmul %70, %69, %cst_35 {dimension_numbers = #tpu.dot_dimension_numbers<[1], [0], [0], [1], [0, 0, 1, 1], [], []>} : vector<8x256xbf16>, vector<256x256xbf16>, vector<8x256xf32> -> vector<8x256xf32>
    %72 = vector.extract_strided_slice %0 {offsets = [6, 0], sizes = [1, 256], strides = [1, 1]} : vector<10x256xf32> to vector<1x256xf32>
    %73 = vector.broadcast %72 : vector<1x256xf32> to vector<8x256xf32>
    %74 = arith.addf %71, %73 : vector<8x256xf32>
    %cst_36 = arith.constant 0.000000e+00 : f32
    %75 = vector.broadcast %cst_36 : f32 to vector<8x256xf32>
    %76 = arith.cmpf ogt, %74, %75 : vector<8x256xf32>
    %cst_37 = arith.constant 2.000000e-01 : f32
    %77 = vector.broadcast %cst_37 : f32 to vector<8x256xf32>
    %78 = arith.mulf %77, %74 : vector<8x256xf32>
    %79 = arith.select %76, %74, %78 : vector<8x256xi1>, vector<8x256xf32>
    %c5 = arith.constant 5 : index
    %c0_38 = arith.constant 0 : index
    %c0_39 = arith.constant 0 : index
    %80 = vector.load %arg5[%c5, %c0_38, %c0_39] : memref<8x256x256xbf16, #tpu.memory_space<vmem>>, vector<1x256x256xbf16>
    %81 = vector.shape_cast %80 : vector<1x256x256xbf16> to vector<256x256xbf16>
    %82 = arith.truncf %79 : vector<8x256xf32> to vector<8x256xbf16>
    %cst_40 = arith.constant dense<0.000000e+00> : vector<8x256xf32>
    %83 = tpu.matmul %82, %81, %cst_40 {dimension_numbers = #tpu.dot_dimension_numbers<[1], [0], [0], [1], [0, 0, 1, 1], [], []>} : vector<8x256xbf16>, vector<256x256xbf16>, vector<8x256xf32> -> vector<8x256xf32>
    %84 = vector.extract_strided_slice %0 {offsets = [7, 0], sizes = [1, 256], strides = [1, 1]} : vector<10x256xf32> to vector<1x256xf32>
    %85 = vector.broadcast %84 : vector<1x256xf32> to vector<8x256xf32>
    %86 = arith.addf %83, %85 : vector<8x256xf32>
    %87 = tpu.concatenate %43, %86 in 0 : vector<8x256xf32>, vector<8x256xf32> -> vector<16x256xf32>
    %c6 = arith.constant 6 : index
    %c0_41 = arith.constant 0 : index
    %c0_42 = arith.constant 0 : index
    %88 = vector.load %arg5[%c6, %c0_41, %c0_42] : memref<8x256x256xbf16, #tpu.memory_space<vmem>>, vector<1x256x256xbf16>
    %89 = vector.shape_cast %88 : vector<1x256x256xbf16> to vector<256x256xbf16>
    %90 = arith.truncf %87 : vector<16x256xf32> to vector<16x256xbf16>
    %cst_43 = arith.constant dense<0.000000e+00> : vector<16x256xf32>
    %91 = tpu.matmul %90, %89, %cst_43 {dimension_numbers = #tpu.dot_dimension_numbers<[1], [0], [0], [1], [0, 0, 1, 1], [], []>} : vector<16x256xbf16>, vector<256x256xbf16>, vector<16x256xf32> -> vector<16x256xf32>
    %92 = vector.extract_strided_slice %0 {offsets = [8, 0], sizes = [1, 256], strides = [1, 1]} : vector<10x256xf32> to vector<1x256xf32>
    %93 = vector.broadcast %92 : vector<1x256xf32> to vector<16x256xf32>
    %94 = arith.addf %91, %93 : vector<16x256xf32>
    %cst_44 = arith.constant 0.000000e+00 : f32
    %95 = vector.broadcast %cst_44 : f32 to vector<16x256xf32>
    %96 = arith.maximumf %94, %95 : vector<16x256xf32>
    %c7 = arith.constant 7 : index
    %c0_45 = arith.constant 0 : index
    %c0_46 = arith.constant 0 : index
    %97 = vector.load %arg5[%c7, %c0_45, %c0_46] : memref<8x256x256xbf16, #tpu.memory_space<vmem>>, vector<1x256x256xbf16>
    %98 = vector.shape_cast %97 : vector<1x256x256xbf16> to vector<256x256xbf16>
    %99 = arith.truncf %96 : vector<16x256xf32> to vector<16x256xbf16>
    %cst_47 = arith.constant dense<0.000000e+00> : vector<16x256xf32>
    %100 = tpu.matmul %99, %98, %cst_47 {dimension_numbers = #tpu.dot_dimension_numbers<[1], [0], [0], [1], [0, 0, 1, 1], [], []>} : vector<16x256xbf16>, vector<256x256xbf16>, vector<16x256xf32> -> vector<16x256xf32>
    %101 = vector.extract_strided_slice %0 {offsets = [9, 0], sizes = [1, 256], strides = [1, 1]} : vector<10x256xf32> to vector<1x256xf32>
    %102 = vector.broadcast %101 : vector<1x256xf32> to vector<16x256xf32>
    %103 = arith.addf %100, %102 : vector<16x256xf32>
    %104 = vector.extract_strided_slice %103 {offsets = [0, 0], sizes = [8, 256], strides = [1, 1]} : vector<16x256xf32> to vector<8x256xf32>
    %c0_48 = arith.constant 0 : index
    %c0_49 = arith.constant 0 : index
    %105 = vector.load %arg7[%c0_48, %c0_49] : memref<8x256xf32, #tpu.memory_space<vmem>>, vector<8x256xf32>
    tpu.vector_store %arg7[%c0_48, %c0_49], %104 {strides = array<i32>} : memref<8x256xf32, #tpu.memory_space<vmem>>, vector<8x256xf32>,
    %106 = vector.extract_strided_slice %103 {offsets = [8, 0], sizes = [8, 256], strides = [1, 1]} : vector<16x256xf32> to vector<8x256xf32>
    %c0_50 = arith.constant 0 : index
    %c0_51 = arith.constant 0 : index
    %107 = vector.load %arg8[%c0_50, %c0_51] : memref<8x256xf32, #tpu.memory_space<vmem>>, vector<8x256xf32>
    tpu.vector_store %arg8[%c0_50, %c0_51], %106 {strides = array<i32>} : memref<8x256xf32, #tpu.memory_space<vmem>>, vector<8x256xf32>,
    return
  }
  func.func @transform_0(%arg0: i32) -> (i32, i32) {
    %c0_i32 = arith.constant 0 : i32
    %c0_i32_0 = arith.constant 0 : i32
    return %arg0, %c0_i32 : i32, i32
  }
  func.func @transform_1(%arg0: i32) -> (i32, i32) {
    %c0_i32 = arith.constant 0 : i32
    %c0_i32_0 = arith.constant 0 : i32
    return %arg0, %c0_i32 : i32, i32
  }
  func.func @transform_2(%arg0: i32) -> (i32, i32) {
    %c0_i32 = arith.constant 0 : i32
    %c0_i32_0 = arith.constant 0 : i32
    %c0_i32_1 = arith.constant 0 : i32
    return %c0_i32, %c0_i32_0 : i32, i32
  }
  func.func @transform_3(%arg0: i32) -> (i32, i32) {
    %c0_i32 = arith.constant 0 : i32
    %c0_i32_0 = arith.constant 0 : i32
    %c0_i32_1 = arith.constant 0 : i32
    return %c0_i32, %c0_i32_0 : i32, i32
  }
  func.func @transform_4(%arg0: i32) -> (i32, i32, i32) {
    %c0_i32 = arith.constant 0 : i32
    %c0_i32_0 = arith.constant 0 : i32
    %c0_i32_1 = arith.constant 0 : i32
    %c0_i32_2 = arith.constant 0 : i32
    return %c0_i32, %c0_i32_0, %c0_i32_1 : i32, i32, i32
  }
  func.func @transform_5(%arg0: i32) -> (i32, i32) {
    %c0_i32 = arith.constant 0 : i32
    %c0_i32_0 = arith.constant 0 : i32
    %c0_i32_1 = arith.constant 0 : i32
    return %c0_i32, %c0_i32_0 : i32, i32
  }
  func.func @transform_6(%arg0: i32) -> (i32, i32) {
    %c0_i32 = arith.constant 0 : i32
    %c0_i32_0 = arith.constant 0 : i32
    return %arg0, %c0_i32 : i32, i32
  }
  func.func @transform_7(%arg0: i32) -> (i32, i32) {
    %c0_i32 = arith.constant 0 : i32
    %c0_i32_0 = arith.constant 0 : i32
    return %arg0, %c0_i32 : i32, i32
  }
}

</mosaic_0001>

<bundles_post_ra>
// kernel: tpu_custom_call.1
= control target key start
LH: loop header
LB: loop body
LE: loop exit
PB: predicated region body
PF: predicated region fallthrough
CT: control target
= control target key end

     0   :  { %13 = vsyncpa [#allocation3], 0  ;;  %s3351_s0 = inlined_call_operand.hbm [shape: f32[8,32], index: 0, kind: input, shape index: {}]   ;;  %s3352_s1 = inlined_call_operand.hbm [shape: f32[8,16], index: 1, kind: input, shape index: {}]   ;;  %s3353_s2 = inlined_call_operand.hbm [shape: bf16[32,256], index: 2, kind: input, shape index: {}]   ;;  %s3354_s3 = inlined_call_operand.hbm [shape: bf16[16,256], index: 3, kind: input, shape index: {}]   ;;  %s3355_s4 = inlined_call_operand.hbm [shape: bf16[8,256,256], index: 4, kind: input, shape index: {}]   ;;  %s3356_s5 = inlined_call_operand.hbm [shape: f32[10,256], index: 5, kind: input, shape index: {}]   ;;  %s3357_s6 = inlined_call_operand.hbm [shape: f32[8,256], index: 6, kind: output, shape index: {0}]   ;;  %s3358_s7 = inlined_call_operand.hbm [shape: f32[8,256], index: 7, kind: output, shape index: {1}]  }
   0x1   :  { %14 = vsyncpa [#allocation6], 0 }
   0x2   :  { %15 = vsyncpa [#allocation9], 0 }
   0x3   :  { %16 = vsyncpa [#allocation12], 0 }
   0x4   :  { %17 = vsyncpa [#allocation4], 0 }
   0x5   :  { %18 = vsyncpa [#allocation15], 0  ;;  %s3147_s24 = smov [#allocation5]   ;;  %s2959_s28 = scalar_lea.hbm %s3352_s1, 128 }
   0x6   :  { %s35_s25 = sshll.u32 %s3147_s24, 4  ;;  %p2960_p0 = scmp.ne.s32.totalorder %s3352_s1, %s2959_s28  ;;  %s36_s25 = int_to_ptr.vmem [resolvable:$true] %s35_s25 }
   0x7   :  { %p2963_p1 = scmp.lt.u32.totalorder %s2959_s28, %s3352_s1 }
   0x9   :  { %p2965_p2 = pnand %p2963_p1, %p2960_p0 }
   0xb   :  { %2968 = shalt.err (!%p2965_p2)
}
   0xc   :  { %s2969_s10 = scalar_lea.vmem %s36_s25, 128  ;;  %p2974_p4 = scmp.lt.s32.totalorder %s36_s25, %s36_s25 }
   0xd   :  { %p2970_p3 = scmp.ne.s32.totalorder %s36_s25, %s2969_s10  ;;  %p2975_p5 = scmp.lt.s32.totalorder %s2969_s10, %s2969_s10 }
   0xf   :  { %p2976_p6 = por %p2975_p5, %p2974_p4 }
  0x11   :  { %p2977_p7 = pnand %p2976_p6, %p2970_p3 }
  0x13   :  { %2980 = shalt.err (!%p2977_p7)
}
  0x14   :  { %38 = dma.hbm_to_vmem [thread:$0]  %s3352_s1, 128, %s36_s25, [#allocation6]  }
  0x15   :  { %s3148_s13 = smov [#allocation8]   ;;  %s3149_s15 = smov [#allocation2]  }
  0x16   :  { %s56_s14 = sshll.u32 %s3148_s13, 4  ;;  %s25_s16 = sshll.u32 %s3149_s15, 4  ;;  %s57_s14 = int_to_ptr.vmem [resolvable:$true] %s56_s14  ;;  %s26_s16 = int_to_ptr.vmem [resolvable:$true] %s25_s16 }
  0x17   :  { %s2981_s19 = scalar_lea.hbm %s3354_s3, 256 }
  0x18   :  { %p2982_p8 = scmp.ne.s32.totalorder %s3354_s3, %s2981_s19  ;;  %p2985_p9 = scmp.lt.u32.totalorder %s2981_s19, %s3354_s3 }
  0x1a   :  { %p2987_p10 = pnand %p2985_p9, %p2982_p8 }
  0x1c   :  { %2990 = shalt.err (!%p2987_p10)
}
  0x1d   :  { %s2991_s1 = scalar_lea.vmem %s57_s14, 256  ;;  %p2996_p12 = scmp.lt.s32.totalorder %s57_s14, %s57_s14 }
  0x1e   :  { %p2992_p11 = scmp.ne.s32.totalorder %s57_s14, %s2991_s1  ;;  %p2997_p13 = scmp.lt.s32.totalorder %s2991_s1, %s2991_s1 }
  0x20   :  { %p2998_p0 = por %p2997_p13, %p2996_p12 }
  0x22   :  { %p2999_p1 = pnand %p2998_p0, %p2992_p11 }
  0x24   :  { %3002 = shalt.err (!%p2999_p1)
}
  0x25   :  { %s3150_s24 = smov 128   ;;  %s3151_s25 = smov 8  }
  0x26   :  { %62 = dma.hbm_to_vmem [thread:$0]  %s3354_s3, 256, %s57_s14, [#allocation9], %s3150_s24, %s3150_s24, %s3151_s25  }
  0x27   :  { %s3003_s30 = scalar_lea.hbm %s3351_s0, 128 }
  0x28   :  { %p3004_p2 = scmp.ne.s32.totalorder %s3351_s0, %s3003_s30  ;;  %p3007_p3 = scmp.lt.u32.totalorder %s3003_s30, %s3351_s0 }
  0x2a   :  { %p3009_p4 = pnand %p3007_p3, %p3004_p2 }
  0x2c   :  { %3012 = shalt.err (!%p3009_p4)
}
  0x2d   :  { %s3013_s12 = scalar_lea.vmem %s26_s16, 128  ;;  %p3018_p6 = scmp.lt.s32.totalorder %s26_s16, %s26_s16 }
  0x2e   :  { %p3014_p5 = scmp.ne.s32.totalorder %s26_s16, %s3013_s12  ;;  %p3019_p7 = scmp.lt.s32.totalorder %s3013_s12, %s3013_s12 }
  0x30   :  { %p3020_p8 = por %p3019_p7, %p3018_p6 }
  0x32   :  { %p3021_p9 = pnand %p3020_p8, %p3014_p5 }
  0x34   :  { %3024 = shalt.err (!%p3021_p9)
}
  0x35   :  { %28 = dma.hbm_to_vmem [thread:$0]  %s3351_s0, 128, %s26_s16, [#allocation3]  }
  0x36   :  { %s3152_s14 = smov [#allocation7]   ;;  %s3153_s17 = smov [#allocation10]  }
  0x37   :  { %s44_s15 = sshll.u32 %s3152_s14, 4  ;;  %s68_s18 = sshll.u32 %s3153_s17, 4  ;;  %s45_s15 = int_to_ptr.vmem [resolvable:$true] %s44_s15  ;;  %s69_s18 = int_to_ptr.vmem [resolvable:$true] %s68_s18 }
  0x38   :  { %s3025_s21 = scalar_lea.hbm %s3353_s2, 512 }
  0x39   :  { %p3026_p10 = scmp.ne.s32.totalorder %s3353_s2, %s3025_s21  ;;  %p3029_p11 = scmp.lt.u32.totalorder %s3025_s21, %s3353_s2 }
  0x3b   :  { %p3031_p12 = pnand %p3029_p11, %p3026_p10 }
  0x3d   :  { %3034 = shalt.err (!%p3031_p12)
}
  0x3e   :  { %s3035_s0 = scalar_lea.vmem %s45_s15, 512  ;;  %p3040_p0 = scmp.lt.s32.totalorder %s45_s15, %s45_s15 }
  0x3f   :  { %p3036_p13 = scmp.ne.s32.totalorder %s45_s15, %s3035_s0  ;;  %p3041_p1 = scmp.lt.s32.totalorder %s3035_s0, %s3035_s0 }
  0x41   :  { %p3042_p2 = por %p3041_p1, %p3040_p0 }
  0x43   :  { %p3043_p3 = pnand %p3042_p2, %p3036_p13 }
  0x45   :  { %3046 = shalt.err (!%p3043_p3)
}
  0x46   :  { %50 = dma.hbm_to_vmem [thread:$0]  %s3353_s2, 512, %s45_s15, [#allocation6], %s3150_s24, %s3150_s24, %s3151_s25  }
  0x47   :  { %s3047_s30 = scalar_lea.hbm %s3355_s4, 32768 }
  0x48   :  { %p3048_p4 = scmp.ne.s32.totalorder %s3355_s4, %s3047_s30  ;;  %p3051_p5 = scmp.lt.u32.totalorder %s3047_s30, %s3355_s4 }
  0x4a   :  { %p3053_p6 = pnand %p3051_p5, %p3048_p4 }
  0x4c   :  { %3056 = shalt.err (!%p3053_p6)
}
  0x4d   :  { %s3057_s12 = scalar_lea.vmem %s69_s18, 32768  ;;  %p3062_p8 = scmp.lt.s32.totalorder %s69_s18, %s69_s18 }
  0x4e   :  { %p3058_p7 = scmp.ne.s32.totalorder %s69_s18, %s3057_s12  ;;  %p3063_p9 = scmp.lt.s32.totalorder %s3057_s12, %s3057_s12 }
  0x50   :  { %p3064_p10 = por %p3063_p9, %p3062_p8 }
  0x52   :  { %p3065_p11 = pnand %p3064_p10, %p3058_p7 }
  0x54   :  { %3068 = shalt.err (!%p3065_p11)
}
  0x55   :  { %74 = dma.hbm_to_vmem [thread:$0]  %s3355_s4, 32768, %s69_s18, [#allocation9], %s3150_s24, %s3150_s24, %s3151_s25  }
  0x56   :  { %s3154_s13 = smov [#allocation11]   ;;  %s3069_s19 = scalar_lea.hbm %s3356_s5, 512 }
  0x57   :  { %s80_s14 = sshll.u32 %s3154_s13, 4  ;;  %p3070_p12 = scmp.ne.s32.totalorder %s3356_s5, %s3069_s19  ;;  %s81_s14 = int_to_ptr.vmem [resolvable:$true] %s80_s14 }
  0x58   :  { %p3073_p13 = scmp.lt.u32.totalorder %s3069_s19, %s3356_s5 }
  0x5a   :  { %p3075_p0 = pnand %p3073_p13, %p3070_p12 }
  0x5c   :  { %3078 = shalt.err (!%p3075_p0)
}
  0x5d   :  { %s3079_s1 = scalar_lea.vmem %s81_s14, 512  ;;  %p3084_p2 = scmp.lt.s32.totalorder %s81_s14, %s81_s14 }
  0x5e   :  { %p3080_p1 = scmp.ne.s32.totalorder %s81_s14, %s3079_s1  ;;  %p3085_p3 = scmp.lt.s32.totalorder %s3079_s1, %s3079_s1 }
  0x60   :  { %p3086_p4 = por %p3085_p3, %p3084_p2 }
  0x62   :  { %p3087_p5 = pnand %p3086_p4, %p3080_p1 }
  0x64   :  { %3090 = shalt.err (!%p3087_p5)
}
  0x65   :  { %s3155_s4 = smov 256   ;;  %s3156_s24 = smov 16  }
  0x66   :  { %86 = dma.hbm_to_vmem [thread:$0]  %s3356_s5, 512, %s81_s14, [#allocation12], %s3155_s4, %s3155_s4, %s3156_s24  }
  0x67   :  { %3135 = dma.done.wait [#allocation3], 128  }
  0x68   :  { %3136 = vsyncadd [#allocation3], 4294967168 }
  0x69   :  { %3137 = dma.done.wait [#allocation6], 640  }
  0x6a   :  { %3138 = vsyncadd [#allocation6], 4294966656 }
  0x6b   :  { %3139 = dma.done.wait [#allocation9], 33024  }
  0x6c   :  { %3140 = vsyncadd [#allocation9], 4294934272 }
  0x6d   :  { %3141 = dma.done.wait [#allocation12], 512  }
  0x6e   :  { %3142 = vsyncadd [#allocation12], 4294966784  ;;  %v3157_v0 = vmov 0   ;;  %v2564_v1 = vld [vmem:[#allocation7 + $0x4] ss:$8 sps:$4 sm:$0xff]   ;;  %v110_v5 = vld [vmem:[#allocation2] sm:$0xff] }
  0x6f   :  { %180 = vmatprep.mubr.bf16.mxu1 %v3157_v0  ;;  %v2566_v2 = vld [vmem:[#allocation7] ss:$8 sps:$4 sm:$0xff]   ;;  %148 = vmatprep.subr.bf16.mxu1 %v2564_v1  ;;  %v2567_v3 = vld [vmem:[#allocation7 + $0x14] ss:$8 sps:$4 sm:$0xff]   ;;  %v2569_v4 = vld [vmem:[#allocation7 + $0x10] ss:$8 sps:$4 sm:$0xff]   ;;  %v115_v7 = vpack.c.bf16 %v110_v5, %v110_v5 }
  0x70   :  { %149 = vmatpush1.bf16.msra.mxu1 %v2566_v2  ;;  %v2572_v6 = vld [vmem:[#allocation10 + $0x4] ss:$8 sps:$4 sm:$0xff]   ;;  %vm144_vm0 = vcmask 261120   ;;  %v2570_v8 = vld [vmem:[#allocation10] ss:$8 sps:$4 sm:$0xff]   ;;  %vm960_vm5 = vcmask 130048  }
  0x71   :  { %150 = vmatprep.subr.bf16.mxu1 %v2567_v3  ;;  %v2575_v9 = vld [vmem:[#allocation10 + $0x14] ss:$8 sps:$4 sm:$0xff]   ;;  %v2573_v10 = vld [vmem:[#allocation10 + $0x10] ss:$8 sps:$4 sm:$0xff]   ;;  %v2578_v11 = vld [vmem:[#allocation10 + $0x24] ss:$8 sps:$4 sm:$0xff]  }
  0x72   :  { %v2576_v12 = vld [vmem:[#allocation10 + $0x20] ss:$8 sps:$4 sm:$0xff]   ;;  %v2581_v13 = vld [vmem:[#allocation10 + $0x34] ss:$8 sps:$4 sm:$0xff]   ;;  %v2579_v14 = vld [vmem:[#allocation10 + $0x30] ss:$8 sps:$4 sm:$0xff]  }
  0x73   :  { %v2584_v15 = vld [vmem:[#allocation10 + $0x44] ss:$8 sps:$4 sm:$0xff]   ;;  %v2582_v16 = vld [vmem:[#allocation10 + $0x40] ss:$8 sps:$4 sm:$0xff]   ;;  %v2587_v17 = vld [vmem:[#allocation10 + $0x54] ss:$8 sps:$4 sm:$0xff]  }
  0x74   :  { %151 = vmatpush1.bf16.msra.mxu1 %v2569_v4  ;;  %v2585_v18 = vld [vmem:[#allocation10 + $0x50] ss:$8 sps:$4 sm:$0xff]   ;;  %v2590_v19 = vld [vmem:[#allocation10 + $0x64] ss:$8 sps:$4 sm:$0xff]   ;;  %v2588_v20 = vld [vmem:[#allocation10 + $0x60] ss:$8 sps:$4 sm:$0xff]   ;;  %v116_v4 = vlaneseq }
  0x75   :  { %397 = vmatprep.subr.bf16.mxu1 %v2572_v6  ;;  %v2593_v21 = vld [vmem:[#allocation10 + $0x74] ss:$8 sps:$4 sm:$0xff]   ;;  %v2591_v22 = vld [vmem:[#allocation10 + $0x70] ss:$8 sps:$4 sm:$0xff]   ;;  %v2596_v23 = vld [vmem:[#allocation10 + $0x84] ss:$8 sps:$4 sm:$0xff]  }
  0x76   :  { %v2594_v24 = vld [vmem:[#allocation10 + $0x80] ss:$8 sps:$4 sm:$0xff]   ;;  %v2599_v25 = vld [vmem:[#allocation10 + $0x94] ss:$8 sps:$4 sm:$0xff]   ;;  %v2597_v26 = vld [vmem:[#allocation10 + $0x90] ss:$8 sps:$4 sm:$0xff]  }
  0x77   :  { %2291 = vmatmul.mubr.msk.bf16.vlgmr.msra.gmra.mrb[0].mxu1 %vm144_vm0, %v115_v7  ;;  %v2602_v27 = vld [vmem:[#allocation10 + $0xa4] ss:$8 sps:$4 sm:$0xff]   ;;  %v2600_v28 = vld [vmem:[#allocation10 + $0xa0] ss:$8 sps:$4 sm:$0xff]   ;;  %v2605_v29 = vld [vmem:[#allocation10 + $0xb4] ss:$8 sps:$4 sm:$0xff]  }
  0x78   :  { %398 = vmatpush1.bf16.msra.mxu1 %v2570_v8  ;;  %v2603_v30 = vld [vmem:[#allocation10 + $0xb0] ss:$8 sps:$4 sm:$0xff]   ;;  %v2608_v31 = vld [vmem:[#allocation10 + $0xc4] ss:$8 sps:$4 sm:$0xff]   ;;  %v2606_v32 = vld [vmem:[#allocation10 + $0xc0] ss:$8 sps:$4 sm:$0xff]  }
  0x79   :  { %399 = vmatprep.subr.bf16.mxu1 %v2575_v9  ;;  %v2611_v33 = vld [vmem:[#allocation10 + $0xd4] ss:$8 sps:$4 sm:$0xff]   ;;  %v2609_v34 = vld [vmem:[#allocation10 + $0xd0] ss:$8 sps:$4 sm:$0xff]   ;;  %v2614_v35 = vld [vmem:[#allocation10 + $0xe4] ss:$8 sps:$4 sm:$0xff]  }
  0x7a   :  { %v2612_v36 = vld [vmem:[#allocation10 + $0xe0] ss:$8 sps:$4 sm:$0xff]   ;;  %v2617_v37 = vld [vmem:[#allocation10 + $0xf4] ss:$8 sps:$4 sm:$0xff]   ;;  %v2615_v38 = vld [vmem:[#allocation10 + $0xf0] ss:$8 sps:$4 sm:$0xff]  }
  0x7b   :  { %v2618_v39 = vld [vmem:[#allocation10 + $0x104] ss:$8 sps:$4 sm:$0xff]   ;;  %v2620_v40 = vld [vmem:[#allocation10 + $0x100] ss:$8 sps:$4 sm:$0xff]   ;;  %v2621_v41 = vld [vmem:[#allocation10 + $0x114] ss:$8 sps:$4 sm:$0xff]  }
  0x7c   :  { %400 = vmatpush1.bf16.msra.mxu1 %v2573_v10  ;;  %647 = vmatprep.subr.bf16.mxu0 %v2618_v39  ;;  %v2623_v42 = vld [vmem:[#allocation10 + $0x110] ss:$8 sps:$4 sm:$0xff]   ;;  %v2624_v43 = vld [vmem:[#allocation10 + $0x124] ss:$8 sps:$4 sm:$0xff]   ;;  %v2626_v44 = vld [vmem:[#allocation10 + $0x120] ss:$8 sps:$4 sm:$0xff]  }
  0x7d   :  { %401 = vmatprep.subr.bf16.mxu1 %v2578_v11  ;;  %648 = vmatpush1.bf16.msra.mxu0 %v2620_v40  ;;  %v2627_v45 = vld [vmem:[#allocation10 + $0x134] ss:$8 sps:$4 sm:$0xff]   ;;  %v2629_v46 = vld [vmem:[#allocation10 + $0x130] ss:$8 sps:$4 sm:$0xff]   ;;  %v2630_v47 = vld [vmem:[#allocation10 + $0x144] ss:$8 sps:$4 sm:$0xff]  }
  0x7e   :  { %649 = vmatprep.subr.bf16.mxu0 %v2621_v41  ;;  %v2632_v48 = vld [vmem:[#allocation10 + $0x140] ss:$8 sps:$4 sm:$0xff]   ;;  %v2633_v49 = vld [vmem:[#allocation10 + $0x154] ss:$8 sps:$4 sm:$0xff]   ;;  %v2635_v50 = vld [vmem:[#allocation10 + $0x150] ss:$8 sps:$4 sm:$0xff]  }
  0x7f   :  { %v2636_v51 = vld [vmem:[#allocation10 + $0x164] ss:$8 sps:$4 sm:$0xff]   ;;  %v2638_v52 = vld [vmem:[#allocation10 + $0x160] ss:$8 sps:$4 sm:$0xff]   ;;  %v2639_v53 = vld [vmem:[#allocation10 + $0x174] ss:$8 sps:$4 sm:$0xff]  }
  0x80   :  { %402 = vmatpush1.bf16.msra.mxu1 %v2576_v12  ;;  %v2641_v54 = vld [vmem:[#allocation10 + $0x170] ss:$8 sps:$4 sm:$0xff]   ;;  %v2642_v55 = vld [vmem:[#allocation10 + $0x184] ss:$8 sps:$4 sm:$0xff]   ;;  %v2644_v56 = vld [vmem:[#allocation10 + $0x180] ss:$8 sps:$4 sm:$0xff]  }
  0x81   :  { %403 = vmatprep.subr.bf16.mxu1 %v2581_v13  ;;  %650 = vmatpush1.bf16.msra.mxu0 %v2623_v42  ;;  %v2645_v57 = vld [vmem:[#allocation10 + $0x194] ss:$8 sps:$4 sm:$0xff]   ;;  %v2647_v58 = vld [vmem:[#allocation10 + $0x190] ss:$8 sps:$4 sm:$0xff]   ;;  %v2648_v59 = vld [vmem:[#allocation10 + $0x1a4] ss:$8 sps:$4 sm:$0xff]  }
  0x82   :  { %651 = vmatprep.subr.bf16.mxu0 %v2624_v43  ;;  %v2650_v60 = vld [vmem:[#allocation10 + $0x1a0] ss:$8 sps:$4 sm:$0xff]   ;;  %v2651_v61 = vld [vmem:[#allocation10 + $0x1b4] ss:$8 sps:$4 sm:$0xff]   ;;  %v2653_v62 = vld [vmem:[#allocation10 + $0x1b0] ss:$8 sps:$4 sm:$0xff]  }
  0x83   :  { %v2654_v63 = vld [vmem:[#allocation10 + $0x1c4] ss:$8 sps:$4 sm:$0xff]   ;;  %v2656_v1 = vld [vmem:[#allocation10 + $0x1c0] ss:$8 sps:$4 sm:$0xff]   ;;  %v2657_v2 = vld [vmem:[#allocation10 + $0x1d4] ss:$8 sps:$4 sm:$0xff]  }
  0x84   :  { %404 = vmatpush1.bf16.msra.mxu1 %v2579_v14  ;;  %v2659_v3 = vld [vmem:[#allocation10 + $0x1d0] ss:$8 sps:$4 sm:$0xff]   ;;  %v3282_v5 = vshrl.u32 %v116_v4, 7  ;;  %v3287_v7 = vld [vmem:[#allocation11] sm:$0xff]  ;;  %v3289_v8 = vld [vmem:[#allocation11 + $0x8] sm:$0xff]  ;;  %s3158_s5 = smov [#allocation13]  }
  0x85   :  { %405 = vmatprep.subr.bf16.mxu1 %v2584_v15  ;;  %652 = vmatpush1.bf16.msra.mxu0 %v2626_v44  ;;  %v2693_v39 = vld [vmem:[#allocation10 + $0x250] ss:$8 sps:$4 sm:$0xff]   ;;  %v2701_v40 = vld [vmem:[#allocation10 + $0x264] ss:$8 sps:$4 sm:$0xff]   ;;  %v2699_v41 = vld [vmem:[#allocation10 + $0x260] ss:$8 sps:$4 sm:$0xff]  }
  0x86   :  { %653 = vmatprep.subr.bf16.mxu0 %v2627_v45  ;;  %v3285_v6 = vsub.s32 0, %v3282_v5  ;;  %v2707_v42 = vld [vmem:[#allocation10 + $0x274] ss:$8 sps:$4 sm:$0xff]   ;;  %v2705_v43 = vld [vmem:[#allocation10 + $0x270] ss:$8 sps:$4 sm:$0xff]   ;;  %s2261_s26 = sshll.u32 %s3158_s5, 4  ;;  %s2262_s26 = int_to_ptr.vmem [resolvable:$true] %s2261_s26 }
  0x87   :  { %v2713_v44 = vld [vmem:[#allocation10 + $0x284] ss:$8 sps:$4 sm:$0xff]   ;;  %v2711_v45 = vld [vmem:[#allocation10 + $0x280] ss:$8 sps:$4 sm:$0xff]   ;;  %s3159_s0 = smov [#allocation14]   ;;  %s3091_s27 = scalar_lea.vmem %s2262_s26, 256 }
  0x88   :  { %406 = vmatpush1.bf16.msra.mxu1 %v2582_v16  ;;  %v119_v9 = vrot.slane %v3287_v7, %v3285_v6  ;;  %v123_v10 = vrot.slane %v3289_v8, %v3285_v6  ;;  %s2271_s16 = sshll.u32 %s3159_s0, 4  ;;  %p3092_p6 = scmp.ne.s32.totalorder %s2262_s26, %s3091_s27  ;;  %s2272_s16 = int_to_ptr.vmem [resolvable:$true] %s2271_s16 }
  0x89   :  { %407 = vmatprep.subr.bf16.mxu1 %v2587_v17  ;;  %654 = vmatpush1.bf16.msra.mxu0 %v2629_v46  ;;  %v2719_v46 = vld [vmem:[#allocation10 + $0x294] ss:$8 sps:$4 sm:$0xff]   ;;  %p3096_p7 = scmp.lt.s32.totalorder %s2262_s26, %s2262_s26  ;;  %p3097_p8 = scmp.lt.s32.totalorder %s3091_s27, %s3091_s27 }
  0x8a   :  { %655 = vmatprep.subr.bf16.mxu0 %v2630_v47  ;;  %v2717_v47 = vld [vmem:[#allocation10 + $0x290] ss:$8 sps:$4 sm:$0xff]  }
  0x8b   :  { %p3098_p9 = por %p3097_p8, %p3096_p7 }
  0x8c   :  { %408 = vmatpush1.bf16.msra.mxu1 %v2585_v18 }
  0x8d   :  { %409 = vmatprep.subr.bf16.mxu1 %v2590_v19  ;;  %656 = vmatpush1.bf16.msra.mxu0 %v2632_v48  ;;  %v2725_v48 = vld [vmem:[#allocation10 + $0x2a4] ss:$8 sps:$4 sm:$0xff]   ;;  %p3099_p10 = pnand %p3098_p9, %p3092_p6 }
  0x8e   :  { %657 = vmatprep.subr.bf16.mxu0 %v2633_v49  ;;  %v2723_v49 = vld [vmem:[#allocation10 + $0x2a0] ss:$8 sps:$4 sm:$0xff]  }
  0x90   :  { %410 = vmatpush1.bf16.msra.mxu1 %v2588_v20 }
  0x91   :  { %411 = vmatprep.subr.bf16.mxu1 %v2593_v21  ;;  %658 = vmatpush1.bf16.msra.mxu0 %v2635_v50  ;;  %v2731_v50 = vld [vmem:[#allocation10 + $0x2b4] ss:$8 sps:$4 sm:$0xff]  }
  0x92   :  { %659 = vmatprep.subr.bf16.mxu0 %v2636_v51  ;;  %v2729_v51 = vld [vmem:[#allocation10 + $0x2b0] ss:$8 sps:$4 sm:$0xff]  }
  0x94   :  { %412 = vmatpush1.bf16.msra.mxu1 %v2591_v22 }
  0x95   :  { %413 = vmatprep.subr.bf16.mxu1 %v2596_v23  ;;  %660 = vmatpush1.bf16.msra.mxu0 %v2638_v52  ;;  %v2660_v23 = vld [vmem:[#allocation10 + $0x1e4] ss:$8 sps:$4 sm:$0xff]  }
  0x96   :  { %661 = vmatprep.subr.bf16.mxu0 %v2639_v53  ;;  %v2737_v52 = vld [vmem:[#allocation10 + $0x2c4] ss:$8 sps:$4 sm:$0xff]   ;;  %v2735_v53 = vld [vmem:[#allocation10 + $0x2c0] ss:$8 sps:$4 sm:$0xff]  }
  0x98   :  { %414 = vmatpush1.bf16.msra.mxu1 %v2594_v24  ;;  %v2662_v24 = vld [vmem:[#allocation10 + $0x1e0] ss:$8 sps:$4 sm:$0xff]  }
  0x99   :  { %415 = vmatprep.subr.bf16.mxu1 %v2599_v25  ;;  %662 = vmatpush1.bf16.msra.mxu0 %v2641_v54  ;;  %v2663_v25 = vld [vmem:[#allocation10 + $0x1f4] ss:$8 sps:$4 sm:$0xff]  }
  0x9a   :  { %663 = vmatprep.subr.bf16.mxu0 %v2642_v55  ;;  %v2743_v54 = vld [vmem:[#allocation10 + $0x2d4] ss:$8 sps:$4 sm:$0xff]   ;;  %v2741_v55 = vld [vmem:[#allocation10 + $0x2d0] ss:$8 sps:$4 sm:$0xff]  }
  0x9c   :  { %416 = vmatpush1.bf16.msra.mxu1 %v2597_v26  ;;  %v2665_v26 = vld [vmem:[#allocation10 + $0x1f0] ss:$8 sps:$4 sm:$0xff]  }
  0x9d   :  { %417 = vmatprep.subr.bf16.mxu1 %v2602_v27  ;;  %664 = vmatpush1.bf16.msra.mxu0 %v2644_v56  ;;  %v2668_v27 = vld [vmem:[#allocation8 + $0x4] ss:$8 sps:$4 sm:$0xff]   ;;  %v3296_v56 = vsub.s32 1, %v3282_v5 }
  0x9e   :  { %665 = vmatprep.subr.bf16.mxu0 %v2645_v57 }
  0x9f   :  { %v232_v57 = vrot.slane %v3287_v7, %v3296_v56 }
  0xa0   :  { %418 = vmatpush1.bf16.msra.mxu1 %v2600_v28  ;;  %v2669_v28 = vld [vmem:[#allocation10 + $0x200] ss:$8 sps:$4 sm:$0xff]  }
  0xa1   :  { %419 = vmatprep.subr.bf16.mxu1 %v2605_v29  ;;  %666 = vmatpush1.bf16.msra.mxu0 %v2647_v58  ;;  %v2671_v29 = vld [vmem:[#allocation10 + $0x204] ss:$8 sps:$4 sm:$0xff]   ;;  %v236_v58 = vrot.slane %v3289_v8, %v3296_v56 }
  0xa2   :  { %667 = vmatprep.subr.bf16.mxu0 %v2648_v59 }
  0xa4   :  { %420 = vmatpush1.bf16.msra.mxu1 %v2603_v30  ;;  %v2674_v30 = vld [vmem:[#allocation10 + $0x214] ss:$8 sps:$4 sm:$0xff]  }
  0xa5   :  { %421 = vmatprep.subr.bf16.mxu1 %v2608_v31  ;;  %668 = vmatpush1.bf16.msra.mxu0 %v2650_v60  ;;  %v2672_v31 = vld [vmem:[#allocation10 + $0x210] ss:$8 sps:$4 sm:$0xff]  }
  0xa6   :  { %669 = vmatprep.subr.bf16.mxu0 %v2651_v61 }
  0xa8   :  { %422 = vmatpush1.bf16.msra.mxu1 %v2606_v32  ;;  %v2677_v32 = vld [vmem:[#allocation10 + $0x224] ss:$8 sps:$4 sm:$0xff]  }
  0xa9   :  { %423 = vmatprep.subr.bf16.mxu1 %v2611_v33  ;;  %670 = vmatpush1.bf16.msra.mxu0 %v2653_v62  ;;  %v2675_v33 = vld [vmem:[#allocation10 + $0x220] ss:$8 sps:$4 sm:$0xff]  }
  0xaa   :  { %671 = vmatprep.subr.bf16.mxu0 %v2654_v63 }
  0xac   :  { %424 = vmatpush1.bf16.msra.mxu1 %v2609_v34  ;;  %v2683_v34 = vld [vmem:[#allocation10 + $0x234] ss:$8 sps:$4 sm:$0xff]  }
  0xad   :  { %425 = vmatprep.subr.bf16.mxu1 %v2614_v35  ;;  %672 = vmatpush1.bf16.msra.mxu0 %v2656_v1  ;;  %v2681_v35 = vld [vmem:[#allocation10 + $0x230] ss:$8 sps:$4 sm:$0xff]  }
  0xae   :  { %673 = vmatprep.subr.bf16.mxu0 %v2657_v2 }
  0xb0   :  { %426 = vmatpush1.bf16.msra.mxu1 %v2612_v36  ;;  %v2689_v36 = vld [vmem:[#allocation10 + $0x244] ss:$8 sps:$4 sm:$0xff]  }
  0xb1   :  { %427 = vmatprep.subr.bf16.mxu1 %v2617_v37  ;;  %674 = vmatpush1.bf16.msra.mxu0 %v2659_v3  ;;  %v2687_v37 = vld [vmem:[#allocation10 + $0x240] ss:$8 sps:$4 sm:$0xff]  }
  0xb2   :  { %675 = vmatprep.subr.bf16.mxu0 %v2660_v23  ;;  %v2704_v23 = vld [vmem:[#allocation10 + $0x344] ss:$8 sps:$4 sm:$0xff]  }
  0xb4   :  { %428 = vmatpush1.bf16.msra.mxu1 %v2615_v38  ;;  %v2695_v38 = vld [vmem:[#allocation10 + $0x254] ss:$8 sps:$4 sm:$0xff]  }
  0xb5   :  { %676 = vmatpush1.bf16.msra.mxu0 %v2662_v24  ;;  %897 = vmatprep.subr.bf16.mxu1 %v2671_v29  ;;  %v2710_v24 = vld [vmem:[#allocation10 + $0x354] ss:$8 sps:$4 sm:$0xff]   ;;  %v2720_v29 = vld [vmem:[#allocation10 + $0x370] ss:$8 sps:$4 sm:$0xff]  }
  0xb6   :  { %677 = vmatprep.subr.bf16.mxu0 %v2663_v25  ;;  %v2708_v25 = vld [vmem:[#allocation10 + $0x350] ss:$8 sps:$4 sm:$0xff]  }
  0xb9   :  { %678 = vmatpush1.bf16.msra.mxu0 %v2665_v26  ;;  %v2716_v26 = vld [vmem:[#allocation10 + $0x364] ss:$8 sps:$4 sm:$0xff]  }
  0xba   :  { %964 = vmatprep.subr.bf16.mxu0 %v2668_v27  ;;  %v2714_v27 = vld [vmem:[#allocation10 + $0x360] ss:$8 sps:$4 sm:$0xff]  }
 0x14a   :  { %v182_v11 = vpop.f32.mrb[0].mxu1 }
 0x14b   :  { %v183_v12 = vadd.f32 %v182_v11, %v119_v9  ;;  %v184_v13 = vpop.f32.mrb[1].mxu1  ;;  %v2666_v11 = vld [vmem:[#allocation8] ss:$8 sps:$4 sm:$0xff]  }
 0x14c   :  { %v185_v14 = vadd.f32 %v184_v13, %v123_v10  ;;  %v186_v15 = vpop.f32.mrb[2].mxu1  ;;  %v2680_v13 = vld [vmem:[#allocation10 + $0x304] ss:$8 sps:$4 sm:$0xff]  }
 0x14d   :  { %vm189_vm1 = vcmp.gt.f32.partialorder %v183_v12, 0.0  ;;  %v191_v16 = vmul.f32 0.2, %v183_v12  ;;  %v187_v17 = vpop.f32.mrb[3].mxu1 }
 0x14e   :  { %vm190_vm2 = vcmp.gt.f32.partialorder %v185_v14, 0.0  ;;  %v192_v18 = vmul.f32 0.2, %v185_v14  ;;  %v2686_v17 = vld [vmem:[#allocation10 + $0x314] ss:$8 sps:$4 sm:$0xff]  }
 0x14f   :  { %v193_v19 = vsel %vm189_vm1, %v183_v12, %v191_v16  ;;  %v2678_v16 = vld [vmem:[#allocation10 + $0x300] ss:$8 sps:$4 sm:$0xff]  }
 0x150   :  { %v194_v20 = vsel %vm190_vm2, %v185_v14, %v192_v18  ;;  %v227_v22 = vpack.c.bf16 %v193_v19, %v193_v19  ;;  %v938_v14 = vld [vmem:[#allocation5] sm:$0xff]  ;;  %v2684_v18 = vld [vmem:[#allocation10 + $0x310] ss:$8 sps:$4 sm:$0xff]  }
 0x151   :  { %v228_v21 = vpack.c.bf16 %v194_v20, %v194_v20  ;;  %v941_v15 = vpack.c.bf16 %v938_v14, %v938_v14  ;;  %v2692_v19 = vld [vmem:[#allocation10 + $0x324] ss:$8 sps:$4 sm:$0xff]   ;;  %v2690_v20 = vld [vmem:[#allocation10 + $0x320] ss:$8 sps:$4 sm:$0xff]  }
 0x153   :  { %429 = vmatprep.mubr.bf16.mxu1 %v228_v21  ;;  %v2698_v21 = vld [vmem:[#allocation10 + $0x334] ss:$8 sps:$4 sm:$0xff]  }
 0x154   :  { %430 = vmatmul.mubr.bf16.vlgmr.msra.gmra.mrb[4].mxu1 %v227_v22  ;;  %v2696_v22 = vld [vmem:[#allocation10 + $0x330] ss:$8 sps:$4 sm:$0xff]  }
 0x155   :  { %898 = vmatpush1.bf16.msra.mxu1 %v2669_v28  ;;  %v2722_v28 = vld [vmem:[#allocation10 + $0x374] ss:$8 sps:$4 sm:$0xff]  }
 0x156   :  { %899 = vmatprep.subr.bf16.mxu1 %v2674_v30  ;;  %v2728_v30 = vld [vmem:[#allocation10 + $0x384] ss:$8 sps:$4 sm:$0xff]  }
 0x159   :  { %900 = vmatpush1.bf16.msra.mxu1 %v2672_v31  ;;  %v2726_v31 = vld [vmem:[#allocation10 + $0x380] ss:$8 sps:$4 sm:$0xff]  }
 0x15a   :  { %901 = vmatprep.subr.bf16.mxu1 %v2677_v32  ;;  %v2734_v32 = vld [vmem:[#allocation10 + $0x394] ss:$8 sps:$4 sm:$0xff]  }
 0x15d   :  { %902 = vmatpush1.bf16.msra.mxu1 %v2675_v33  ;;  %v2732_v33 = vld [vmem:[#allocation10 + $0x390] ss:$8 sps:$4 sm:$0xff]  }
 0x15e   :  { %903 = vmatprep.subr.bf16.mxu1 %v2683_v34  ;;  %v2740_v34 = vld [vmem:[#allocation10 + $0x3a4] ss:$8 sps:$4 sm:$0xff]  }
 0x161   :  { %904 = vmatpush1.bf16.msra.mxu1 %v2681_v35  ;;  %v2738_v35 = vld [vmem:[#allocation10 + $0x3a0] ss:$8 sps:$4 sm:$0xff]  }
 0x162   :  { %905 = vmatprep.subr.bf16.mxu1 %v2689_v36  ;;  %v2746_v36 = vld [vmem:[#allocation10 + $0x3b4] ss:$8 sps:$4 sm:$0xff]  }
 0x165   :  { %906 = vmatpush1.bf16.msra.mxu1 %v2687_v37  ;;  %v2744_v37 = vld [vmem:[#allocation10 + $0x3b0] ss:$8 sps:$4 sm:$0xff]  }
 0x166   :  { %907 = vmatprep.subr.bf16.mxu1 %v2695_v38  ;;  %v2749_v38 = vld [vmem:[#allocation10 + $0x2e4] ss:$8 sps:$4 sm:$0xff]  }
 0x169   :  { %908 = vmatpush1.bf16.msra.mxu1 %v2693_v39  ;;  %v2752_v39 = vld [vmem:[#allocation10 + $0x3c4] ss:$8 sps:$4 sm:$0xff]  }
 0x16a   :  { %909 = vmatprep.subr.bf16.mxu1 %v2701_v40  ;;  %v2747_v40 = vld [vmem:[#allocation10 + $0x2e0] ss:$8 sps:$4 sm:$0xff]  }
 0x16d   :  { %910 = vmatpush1.bf16.msra.mxu1 %v2699_v41  ;;  %v2750_v41 = vld [vmem:[#allocation10 + $0x3c0] ss:$8 sps:$4 sm:$0xff]  }
 0x16e   :  { %911 = vmatprep.subr.bf16.mxu1 %v2707_v42  ;;  %v2755_v42 = vld [vmem:[#allocation10 + $0x2f4] ss:$8 sps:$4 sm:$0xff]  }
 0x171   :  { %912 = vmatpush1.bf16.msra.mxu1 %v2705_v43  ;;  %v2758_v43 = vld [vmem:[#allocation10 + $0x3d4] ss:$8 sps:$4 sm:$0xff]  }
 0x172   :  { %913 = vmatprep.subr.bf16.mxu1 %v2713_v44  ;;  %v2753_v44 = vld [vmem:[#allocation10 + $0x2f0] ss:$8 sps:$4 sm:$0xff]  }
 0x175   :  { %914 = vmatpush1.bf16.msra.mxu1 %v2711_v45  ;;  %v2756_v45 = vld [vmem:[#allocation10 + $0x3d0] ss:$8 sps:$4 sm:$0xff]  }
 0x176   :  { %915 = vmatprep.subr.bf16.mxu1 %v2719_v46  ;;  %v2761_v46 = vld [vmem:[#allocation10 + $0x3e4] ss:$8 sps:$4 sm:$0xff]  }
 0x179   :  { %916 = vmatpush1.bf16.msra.mxu1 %v2717_v47  ;;  %v2759_v47 = vld [vmem:[#allocation10 + $0x3e0] ss:$8 sps:$4 sm:$0xff]  }
 0x17a   :  { %917 = vmatprep.subr.bf16.mxu1 %v2725_v48  ;;  %v2764_v48 = vld [vmem:[#allocation10 + $0x3f4] ss:$8 sps:$4 sm:$0xff]  }
 0x17d   :  { %918 = vmatpush1.bf16.msra.mxu1 %v2723_v49  ;;  %v2762_v49 = vld [vmem:[#allocation10 + $0x3f0] ss:$8 sps:$4 sm:$0xff]  }
 0x17e   :  { %919 = vmatprep.subr.bf16.mxu1 %v2731_v50  ;;  %v2767_v50 = vld [vmem:[#allocation10 + $0x404] ss:$8 sps:$4 sm:$0xff]  }
 0x181   :  { %920 = vmatpush1.bf16.msra.mxu1 %v2729_v51  ;;  %v481_v51 = vsub.s32 2, %v3282_v5 }
 0x182   :  { %921 = vmatprep.subr.bf16.mxu1 %v2737_v52 }
 0x183   :  { %v482_v52 = vrot.slane %v3287_v7, %v481_v51 }
 0x185   :  { %922 = vmatpush1.bf16.msra.mxu1 %v2735_v53  ;;  %v486_v53 = vrot.slane %v3289_v8, %v481_v51  ;;  %v2812_v51 = vld [vmem:[#allocation10 + $0x4f4] ss:$8 sps:$4 sm:$0xff]  }
 0x186   :  { %923 = vmatprep.subr.bf16.mxu1 %v2743_v54 }
 0x189   :  { %924 = vmatpush1.bf16.msra.mxu1 %v2741_v55 }
 0x18a   :  { %925 = vmatprep.subr.bf16.mxu1 %v2749_v38  ;;  %v2789_v38 = vld [vmem:[#allocation10 + $0x480] ss:$8 sps:$4 sm:$0xff]  }
 0x18d   :  { %926 = vmatpush1.bf16.msra.mxu1 %v2747_v40  ;;  %v2792_v40 = vld [vmem:[#allocation10 + $0x490] ss:$8 sps:$4 sm:$0xff]  }
 0x18e   :  { %927 = vmatprep.subr.bf16.mxu1 %v2755_v42  ;;  %v2795_v42 = vld [vmem:[#allocation10 + $0x4a0] ss:$8 sps:$4 sm:$0xff]  }
 0x191   :  { %928 = vmatpush1.bf16.msra.mxu1 %v2753_v44  ;;  %v2798_v44 = vld [vmem:[#allocation10 + $0x4b0] ss:$8 sps:$4 sm:$0xff]  }
 0x192   :  { %1464 = vmatprep.subr.bf16.mxu1 %v2767_v50  ;;  %v2807_v50 = vld [vmem:[#allocation10 + $0x4e0] ss:$8 sps:$4 sm:$0xff]  }
 0x227   :  { %v431_v59 = vpop.f32.mrb[4].mxu1 }
 0x228   :  { %v432_v60 = vadd.f32 %v431_v59, %v232_v57  ;;  %v433_v61 = vpop.f32.mrb[5].mxu1 }
 0x229   :  { %v434_v62 = vadd.f32 %v433_v61, %v236_v58  ;;  %v435_v63 = vpop.f32.mrb[6].mxu1  ;;  %v944_v58 = vsub.s32 4, %v3282_v5 }
 0x22a   :  { %vm438_vm3 = vcmp.gt.f32.partialorder %v432_v60, 0.0  ;;  %v440_v1 = vmul.f32 0.2, %v432_v60  ;;  %v436_v2 = vpop.f32.mrb[7].mxu1 }
 0x22b   :  { %vm439_vm4 = vcmp.gt.f32.partialorder %v434_v62, 0.0  ;;  %v441_v3 = vmul.f32 0.2, %v434_v62  ;;  %v945_v2 = vrot.slane %v3287_v7, %v944_v58 }
 0x22c   :  { %v442_v4 = vsel %vm438_vm3, %v432_v60, %v440_v1 }
 0x22d   :  { %v443_v9 = vsel %vm439_vm4, %v434_v62, %v441_v3  ;;  %v477_v12 = vpack.c.bf16 %v442_v4, %v442_v4  ;;  %v949_v4 = vrot.slane %v3289_v8, %v944_v58  ;;  %v2821_v58 = vld [vmem:[#allocation10 + $0x524] ss:$8 sps:$4 sm:$0xff]  }
 0x22e   :  { %v478_v10 = vpack.c.bf16 %v443_v9, %v443_v9 }
 0x230   :  { %679 = vmatprep.mubr.bf16.mxu0 %v478_v10  ;;  %v2765_v10 = vld [vmem:[#allocation10 + $0x400] ss:$8 sps:$4 sm:$0xff]  }
 0x231   :  { %680 = vmatmul.mubr.bf16.vlgmr.msra.gmra.mrb[0].mxu0 %v477_v12 }
 0x232   :  { %965 = vmatpush1.bf16.msra.mxu0 %v2666_v11  ;;  %996 = vmatprep.mubr.bf16.mxu0 %v3157_v0  ;;  %v2702_v0 = vld [vmem:[#allocation10 + $0x340] ss:$8 sps:$4 sm:$0xff]  }
 0x233   :  { %1214 = vmatprep.subr.bf16.mxu0 %v2680_v13  ;;  %v2770_v13 = vld [vmem:[#allocation10 + $0x414] ss:$8 sps:$4 sm:$0xff]  }
 0x239   :  { %2390 = vmatmul.mubr.msk.bf16.vlgmr.msra.gmra.mrb[4].mxu0 %vm960_vm5, %v941_v15 }
 0x23a   :  { %1215 = vmatpush1.bf16.msra.mxu0 %v2678_v16 }
 0x23b   :  { %1216 = vmatprep.subr.bf16.mxu0 %v2686_v17 }
 0x23e   :  { %1217 = vmatpush1.bf16.msra.mxu0 %v2684_v18 }
 0x23f   :  { %1218 = vmatprep.subr.bf16.mxu0 %v2692_v19 }
 0x242   :  { %1219 = vmatpush1.bf16.msra.mxu0 %v2690_v20  ;;  %v2768_v20 = vld [vmem:[#allocation10 + $0x410] ss:$8 sps:$4 sm:$0xff]  }
 0x243   :  { %1220 = vmatprep.subr.bf16.mxu0 %v2698_v21 }
 0x246   :  { %1221 = vmatpush1.bf16.msra.mxu0 %v2696_v22  ;;  %v2773_v22 = vld [vmem:[#allocation10 + $0x424] ss:$8 sps:$4 sm:$0xff]  }
 0x247   :  { %1222 = vmatprep.subr.bf16.mxu0 %v2704_v23 }
 0x24a   :  { %1223 = vmatpush1.bf16.msra.mxu0 %v2702_v0 }
 0x24b   :  { %1224 = vmatprep.subr.bf16.mxu0 %v2710_v24 }
 0x24e   :  { %1225 = vmatpush1.bf16.msra.mxu0 %v2708_v25  ;;  %v2771_v25 = vld [vmem:[#allocation10 + $0x420] ss:$8 sps:$4 sm:$0xff]  }
 0x24f   :  { %1226 = vmatprep.subr.bf16.mxu0 %v2716_v26 }
 0x252   :  { %1227 = vmatpush1.bf16.msra.mxu0 %v2714_v27  ;;  %v2776_v27 = vld [vmem:[#allocation10 + $0x434] ss:$8 sps:$4 sm:$0xff]  }
 0x253   :  { %1228 = vmatprep.subr.bf16.mxu0 %v2722_v28  ;;  %v2774_v28 = vld [vmem:[#allocation10 + $0x430] ss:$8 sps:$4 sm:$0xff]  }
 0x256   :  { %1229 = vmatpush1.bf16.msra.mxu0 %v2720_v29  ;;  %v2779_v29 = vld [vmem:[#allocation10 + $0x444] ss:$8 sps:$4 sm:$0xff]  }
 0x257   :  { %1230 = vmatprep.subr.bf16.mxu0 %v2728_v30  ;;  %v2777_v30 = vld [vmem:[#allocation10 + $0x440] ss:$8 sps:$4 sm:$0xff]  }
 0x25a   :  { %1231 = vmatpush1.bf16.msra.mxu0 %v2726_v31  ;;  %v2782_v31 = vld [vmem:[#allocation10 + $0x454] ss:$8 sps:$4 sm:$0xff]  }
 0x25b   :  { %1232 = vmatprep.subr.bf16.mxu0 %v2734_v32  ;;  %v2780_v32 = vld [vmem:[#allocation10 + $0x450] ss:$8 sps:$4 sm:$0xff]  }
 0x25e   :  { %1233 = vmatpush1.bf16.msra.mxu0 %v2732_v33  ;;  %v2785_v33 = vld [vmem:[#allocation10 + $0x464] ss:$8 sps:$4 sm:$0xff]  }
 0x25f   :  { %1234 = vmatprep.subr.bf16.mxu0 %v2740_v34  ;;  %v2783_v34 = vld [vmem:[#allocation10 + $0x460] ss:$8 sps:$4 sm:$0xff]  }
 0x262   :  { %1235 = vmatpush1.bf16.msra.mxu0 %v2738_v35  ;;  %v2788_v35 = vld [vmem:[#allocation10 + $0x474] ss:$8 sps:$4 sm:$0xff]  }
 0x263   :  { %1236 = vmatprep.subr.bf16.mxu0 %v2746_v36  ;;  %v2786_v36 = vld [vmem:[#allocation10 + $0x470] ss:$8 sps:$4 sm:$0xff]  }
 0x266   :  { %1237 = vmatpush1.bf16.msra.mxu0 %v2744_v37  ;;  %v2791_v37 = vld [vmem:[#allocation10 + $0x484] ss:$8 sps:$4 sm:$0xff]  }
 0x267   :  { %1238 = vmatprep.subr.bf16.mxu0 %v2752_v39  ;;  %v2794_v39 = vld [vmem:[#allocation10 + $0x494] ss:$8 sps:$4 sm:$0xff]  }
 0x26a   :  { %1239 = vmatpush1.bf16.msra.mxu0 %v2750_v41  ;;  %v2797_v41 = vld [vmem:[#allocation10 + $0x4a4] ss:$8 sps:$4 sm:$0xff]  }
 0x26b   :  { %1240 = vmatprep.subr.bf16.mxu0 %v2758_v43  ;;  %v2800_v43 = vld [vmem:[#allocation10 + $0x4b4] ss:$8 sps:$4 sm:$0xff]  }
 0x26e   :  { %1241 = vmatpush1.bf16.msra.mxu0 %v2756_v45  ;;  %v2803_v45 = vld [vmem:[#allocation10 + $0x4c4] ss:$8 sps:$4 sm:$0xff]  }
 0x26f   :  { %1242 = vmatprep.subr.bf16.mxu0 %v2761_v46  ;;  %v2801_v46 = vld [vmem:[#allocation10 + $0x4c0] ss:$8 sps:$4 sm:$0xff]  }
 0x272   :  { %1243 = vmatpush1.bf16.msra.mxu0 %v2759_v47  ;;  %v2804_v47 = vld [vmem:[#allocation10 + $0x4d0] ss:$8 sps:$4 sm:$0xff]  }
 0x273   :  { %1244 = vmatprep.subr.bf16.mxu0 %v2764_v48  ;;  %v2806_v48 = vld [vmem:[#allocation10 + $0x4d4] ss:$8 sps:$4 sm:$0xff]  }
 0x276   :  { %1245 = vmatpush1.bf16.msra.mxu0 %v2762_v49  ;;  %v2809_v49 = vld [vmem:[#allocation10 + $0x4e4] ss:$8 sps:$4 sm:$0xff]  }
 0x304   :  { %v681_v54 = vpop.f32.mrb[0].mxu0 }
 0x305   :  { %v682_v55 = vadd.f32 %v681_v54, %v482_v52  ;;  %v683_v57 = vpop.f32.mrb[1].mxu0  ;;  %v2810_v52 = vld [vmem:[#allocation10 + $0x4f0] ss:$8 sps:$4 sm:$0xff]   ;;  %v2815_v54 = vld [vmem:[#allocation10 + $0x504] ss:$8 sps:$4 sm:$0xff]  }
 0x306   :  { %v684_v59 = vadd.f32 %v683_v57, %v486_v53  ;;  %v685_v60 = vpop.f32.mrb[2].mxu0  ;;  %v2813_v53 = vld [vmem:[#allocation10 + $0x500] ss:$8 sps:$4 sm:$0xff]   ;;  %1714 = vmatprep.subr.bf16.mxu0 %v2815_v54  ;;  %v2816_v57 = vld [vmem:[#allocation10 + $0x510] ss:$8 sps:$4 sm:$0xff]  }
 0x307   :  { %vm688_vm6 = vcmp.gt.f32.partialorder %v682_v55, 0.0  ;;  %v690_v61 = vmul.f32 0.2, %v682_v55  ;;  %v686_v62 = vpop.f32.mrb[3].mxu0  ;;  %v2824_v60 = vld [vmem:[#allocation10 + $0x534] ss:$8 sps:$4 sm:$0xff]  }
 0x308   :  { %vm689_vm7 = vcmp.gt.f32.partialorder %v684_v59, 0.0  ;;  %v691_v63 = vmul.f32 0.2, %v684_v59  ;;  %v2827_v62 = vld [vmem:[#allocation10 + $0x544] ss:$8 sps:$4 sm:$0xff]  }
 0x309   :  { %v692_v1 = vsel %vm688_vm6, %v682_v55, %v690_v61  ;;  %v2818_v55 = vld [vmem:[#allocation10 + $0x514] ss:$8 sps:$4 sm:$0xff]   ;;  %v2822_v61 = vld [vmem:[#allocation10 + $0x530] ss:$8 sps:$4 sm:$0xff]   ;;  %v2873_v54 = vld [vmem:[#allocation10 + $0x640] ss:$8 sps:$4 sm:$0xff]  }
 0x30a   :  { %v693_v3 = vsel %vm689_vm7, %v684_v59, %v691_v63  ;;  %v727_v11 = vpack.c.bf16 %v692_v1, %v692_v1  ;;  %v2819_v59 = vld [vmem:[#allocation10 + $0x520] ss:$8 sps:$4 sm:$0xff]   ;;  %v2830_v1 = vld [vmem:[#allocation10 + $0x554] ss:$8 sps:$4 sm:$0xff]  }
 0x30b   :  { %v728_v9 = vpack.c.bf16 %v693_v3, %v693_v3  ;;  %v2825_v63 = vld [vmem:[#allocation10 + $0x540] ss:$8 sps:$4 sm:$0xff]   ;;  %v2833_v3 = vld [vmem:[#allocation10 + $0x564] ss:$8 sps:$4 sm:$0xff]  }
 0x30c   :  { %v998_v12 = vpop.f32.mrb[4].mxu0 }
 0x30d   :  { %v999_v14 = vadd.f32 %v998_v12, %v945_v2  ;;  %929 = vmatprep.mubr.bf16.mxu1 %v728_v9  ;;  %v1000_v15 = vpop.f32.mrb[5].mxu0  ;;  %v2828_v2 = vld [vmem:[#allocation10 + $0x550] ss:$8 sps:$4 sm:$0xff]   ;;  %v2836_v9 = vld [vmem:[#allocation10 + $0x574] ss:$8 sps:$4 sm:$0xff]  }
 0x30e   :  { %v1001_v16 = vadd.f32 %v1000_v15, %v949_v4  ;;  %930 = vmatmul.mubr.bf16.vlgmr.msra.gmra.mrb[8].mxu1 %v727_v11  ;;  %v1002_v17 = vpop.f32.mrb[6].mxu0  ;;  %v2831_v4 = vld [vmem:[#allocation10 + $0x560] ss:$8 sps:$4 sm:$0xff]   ;;  %v2839_v11 = vld [vmem:[#allocation10 + $0x584] ss:$8 sps:$4 sm:$0xff]  }
 0x30f   :  { %vm1005_vm8 = vcmp.gt.f32.partialorder %v999_v14, 0.0  ;;  %v1007_v18 = vmul.f32 0.2, %v999_v14  ;;  %v1003_v19 = vpop.f32.mrb[7].mxu0  ;;  %1465 = vmatpush1.bf16.msra.mxu1 %v2765_v10  ;;  %v2834_v10 = vld [vmem:[#allocation10 + $0x570] ss:$8 sps:$4 sm:$0xff]  }
 0x310   :  { %vm1006_vm9 = vcmp.gt.f32.partialorder %v1001_v16, 0.0  ;;  %v1008_v21 = vmul.f32 0.2, %v1001_v16  ;;  %1466 = vmatprep.subr.bf16.mxu1 %v2770_v13  ;;  %v2837_v12 = vld [vmem:[#allocation10 + $0x580] ss:$8 sps:$4 sm:$0xff]  }
 0x311   :  { %v1009_v23 = vsel %vm1005_vm8, %v999_v14, %v1007_v18  ;;  %v2842_v13 = vld [vmem:[#allocation10 + $0x594] ss:$8 sps:$4 sm:$0xff]   ;;  %v2840_v14 = vld [vmem:[#allocation10 + $0x590] ss:$8 sps:$4 sm:$0xff]   ;;  %v2845_v15 = vld [vmem:[#allocation10 + $0x5a4] ss:$8 sps:$4 sm:$0xff]  }
 0x312   :  { %v1010_v0 = vsel %vm1006_vm9, %v1001_v16, %v1008_v21  ;;  %v1044_v26 = vpack.c.bf16 %v1009_v23, %v1009_v23  ;;  %v2843_v16 = vld [vmem:[#allocation10 + $0x5a0] ss:$8 sps:$4 sm:$0xff]   ;;  %v2848_v17 = vld [vmem:[#allocation10 + $0x5b4] ss:$8 sps:$4 sm:$0xff]   ;;  %v2846_v18 = vld [vmem:[#allocation10 + $0x5b0] ss:$8 sps:$4 sm:$0xff]  }
 0x313   :  { %v1045_v24 = vpack.c.bf16 %v1010_v0, %v1010_v0  ;;  %1467 = vmatpush1.bf16.msra.mxu1 %v2768_v20  ;;  %v2851_v19 = vld [vmem:[#allocation10 + $0x5c4] ss:$8 sps:$4 sm:$0xff]   ;;  %v2849_v20 = vld [vmem:[#allocation10 + $0x5c0] ss:$8 sps:$4 sm:$0xff]   ;;  %v2854_v21 = vld [vmem:[#allocation10 + $0x5d4] ss:$8 sps:$4 sm:$0xff]  }
 0x314   :  { %1468 = vmatprep.subr.bf16.mxu1 %v2773_v22  ;;  %v2852_v22 = vld [vmem:[#allocation10 + $0x5d0] ss:$8 sps:$4 sm:$0xff]  }
 0x315   :  { %1246 = vmatprep.mubr.bf16.mxu0 %v1045_v24  ;;  %v1048_v24 = vsub.s32 5, %v3282_v5 }
 0x316   :  { %1247 = vmatmul.mubr.bf16.vlgmr.msra.gmra.mrb[8].mxu0 %v1044_v26 }
 0x317   :  { %1469 = vmatpush1.bf16.msra.mxu1 %v2771_v25  ;;  %1715 = vmatpush1.bf16.msra.mxu0 %v2813_v53  ;;  %v2875_v53 = vld [vmem:[#allocation10 + $0x644] ss:$8 sps:$4 sm:$0xff]  }
 0x318   :  { %1470 = vmatprep.subr.bf16.mxu1 %v2776_v27  ;;  %1716 = vmatprep.subr.bf16.mxu0 %v2818_v55  ;;  %v1049_v27 = vrot.slane %v3287_v7, %v1048_v24  ;;  %v2878_v55 = vld [vmem:[#allocation10 + $0x654] ss:$8 sps:$4 sm:$0xff]  }
 0x31b   :  { %1471 = vmatpush1.bf16.msra.mxu1 %v2774_v28  ;;  %1717 = vmatpush1.bf16.msra.mxu0 %v2816_v57  ;;  %v1053_v28 = vrot.slane %v3289_v8, %v1048_v24  ;;  %v2876_v57 = vld [vmem:[#allocation10 + $0x650] ss:$8 sps:$4 sm:$0xff]  }
 0x31c   :  { %1472 = vmatprep.subr.bf16.mxu1 %v2779_v29  ;;  %1718 = vmatprep.subr.bf16.mxu0 %v2821_v58  ;;  %v2881_v58 = vld [vmem:[#allocation10 + $0x664] ss:$8 sps:$4 sm:$0xff]  }
 0x31f   :  { %1473 = vmatpush1.bf16.msra.mxu1 %v2777_v30  ;;  %1719 = vmatpush1.bf16.msra.mxu0 %v2819_v59  ;;  %v2879_v59 = vld [vmem:[#allocation10 + $0x660] ss:$8 sps:$4 sm:$0xff]  }
 0x320   :  { %1474 = vmatprep.subr.bf16.mxu1 %v2782_v31  ;;  %1720 = vmatprep.subr.bf16.mxu0 %v2824_v60  ;;  %v2884_v60 = vld [vmem:[#allocation10 + $0x674] ss:$8 sps:$4 sm:$0xff]  }
 0x323   :  { %1475 = vmatpush1.bf16.msra.mxu1 %v2780_v32  ;;  %1721 = vmatpush1.bf16.msra.mxu0 %v2822_v61  ;;  %v2882_v61 = vld [vmem:[#allocation10 + $0x670] ss:$8 sps:$4 sm:$0xff]  }
 0x324   :  { %1476 = vmatprep.subr.bf16.mxu1 %v2785_v33  ;;  %1722 = vmatprep.subr.bf16.mxu0 %v2827_v62  ;;  %v2887_v62 = vld [vmem:[#allocation10 + $0x684] ss:$8 sps:$4 sm:$0xff]  }
 0x327   :  { %1477 = vmatpush1.bf16.msra.mxu1 %v2783_v34  ;;  %1723 = vmatpush1.bf16.msra.mxu0 %v2825_v63  ;;  %v2885_v63 = vld [vmem:[#allocation10 + $0x680] ss:$8 sps:$4 sm:$0xff]  }
 0x328   :  { %1478 = vmatprep.subr.bf16.mxu1 %v2788_v35  ;;  %1724 = vmatprep.subr.bf16.mxu0 %v2830_v1  ;;  %v2890_v1 = vld [vmem:[#allocation10 + $0x694] ss:$8 sps:$4 sm:$0xff]  }
 0x32b   :  { %1479 = vmatpush1.bf16.msra.mxu1 %v2786_v36  ;;  %1725 = vmatpush1.bf16.msra.mxu0 %v2828_v2  ;;  %v2888_v2 = vld [vmem:[#allocation10 + $0x690] ss:$8 sps:$4 sm:$0xff]  }
 0x32c   :  { %1480 = vmatprep.subr.bf16.mxu1 %v2791_v37  ;;  %1726 = vmatprep.subr.bf16.mxu0 %v2833_v3  ;;  %v2893_v3 = vld [vmem:[#allocation10 + $0x6a4] ss:$8 sps:$4 sm:$0xff]  }
 0x32f   :  { %1481 = vmatpush1.bf16.msra.mxu1 %v2789_v38  ;;  %1727 = vmatpush1.bf16.msra.mxu0 %v2831_v4  ;;  %v2891_v4 = vld [vmem:[#allocation10 + $0x6a0] ss:$8 sps:$4 sm:$0xff]  }
 0x330   :  { %1482 = vmatprep.subr.bf16.mxu1 %v2794_v39  ;;  %1728 = vmatprep.subr.bf16.mxu0 %v2836_v9  ;;  %v2896_v9 = vld [vmem:[#allocation10 + $0x6b4] ss:$8 sps:$4 sm:$0xff]  }
 0x333   :  { %1483 = vmatpush1.bf16.msra.mxu1 %v2792_v40  ;;  %1729 = vmatpush1.bf16.msra.mxu0 %v2834_v10  ;;  %v2894_v10 = vld [vmem:[#allocation10 + $0x6b0] ss:$8 sps:$4 sm:$0xff]  }
 0x334   :  { %1484 = vmatprep.subr.bf16.mxu1 %v2797_v41  ;;  %1730 = vmatprep.subr.bf16.mxu0 %v2839_v11  ;;  %v2857_v41 = vld [vmem:[#allocation10 + $0x5e4] ss:$8 sps:$4 sm:$0xff]  }
 0x335   :  { %v2899_v11 = vld [vmem:[#allocation10 + $0x6c4] ss:$8 sps:$4 sm:$0xff]  }
 0x337   :  { %1485 = vmatpush1.bf16.msra.mxu1 %v2795_v42  ;;  %1731 = vmatpush1.bf16.msra.mxu0 %v2837_v12  ;;  %v2855_v42 = vld [vmem:[#allocation10 + $0x5e0] ss:$8 sps:$4 sm:$0xff]  }
 0x338   :  { %1486 = vmatprep.subr.bf16.mxu1 %v2800_v43  ;;  %1732 = vmatprep.subr.bf16.mxu0 %v2842_v13  ;;  %v2860_v43 = vld [vmem:[#allocation10 + $0x5f4] ss:$8 sps:$4 sm:$0xff]   ;;  %v2897_v12 = vld [vmem:[#allocation10 + $0x6c0] ss:$8 sps:$4 sm:$0xff]  }
 0x339   :  { %v2902_v13 = vld [vmem:[#allocation10 + $0x6d4] ss:$8 sps:$4 sm:$0xff]  }
 0x33b   :  { %1487 = vmatpush1.bf16.msra.mxu1 %v2798_v44  ;;  %1733 = vmatpush1.bf16.msra.mxu0 %v2840_v14  ;;  %v2858_v44 = vld [vmem:[#allocation10 + $0x5f0] ss:$8 sps:$4 sm:$0xff]  }
 0x33c   :  { %1488 = vmatprep.subr.bf16.mxu1 %v2803_v45  ;;  %1734 = vmatprep.subr.bf16.mxu0 %v2845_v15  ;;  %v2861_v45 = vld [vmem:[#allocation10 + $0x600] ss:$8 sps:$4 sm:$0xff]   ;;  %v2900_v14 = vld [vmem:[#allocation10 + $0x6d0] ss:$8 sps:$4 sm:$0xff]   ;;  %v2905_v15 = vld [vmem:[#allocation10 + $0x6e4] ss:$8 sps:$4 sm:$0xff]  }
 0x33f   :  { %1489 = vmatpush1.bf16.msra.mxu1 %v2801_v46  ;;  %1735 = vmatpush1.bf16.msra.mxu0 %v2843_v16  ;;  %v2863_v46 = vld [vmem:[#allocation10 + $0x604] ss:$8 sps:$4 sm:$0xff]   ;;  %v2903_v16 = vld [vmem:[#allocation10 + $0x6e0] ss:$8 sps:$4 sm:$0xff]  }
 0x340   :  { %1490 = vmatprep.subr.bf16.mxu1 %v2806_v48  ;;  %1736 = vmatprep.subr.bf16.mxu0 %v2848_v17  ;;  %v2864_v48 = vld [vmem:[#allocation10 + $0x610] ss:$8 sps:$4 sm:$0xff]   ;;  %v1298_v17 = vsub.s32 6, %v3282_v5 }
 0x343   :  { %1491 = vmatpush1.bf16.msra.mxu1 %v2804_v47  ;;  %1737 = vmatpush1.bf16.msra.mxu0 %v2846_v18  ;;  %v2866_v47 = vld [vmem:[#allocation10 + $0x614] ss:$8 sps:$4 sm:$0xff]   ;;  %v1299_v18 = vrot.slane %v3287_v7, %v1298_v17  ;;  %v2906_v7 = vld [vmem:[#allocation10 + $0x6f0] ss:$8 sps:$4 sm:$0xff]  }
 0x344   :  { %1492 = vmatprep.subr.bf16.mxu1 %v2809_v49  ;;  %1738 = vmatprep.subr.bf16.mxu0 %v2851_v19  ;;  %v2869_v49 = vld [vmem:[#allocation10 + $0x624] ss:$8 sps:$4 sm:$0xff]   ;;  %v1303_v19 = vrot.slane %v3289_v8, %v1298_v17  ;;  %v2909_v8 = vld [vmem:[#allocation10 + $0x700] ss:$8 sps:$4 sm:$0xff]  }
 0x347   :  { %1493 = vmatpush1.bf16.msra.mxu1 %v2807_v50  ;;  %1739 = vmatpush1.bf16.msra.mxu0 %v2849_v20  ;;  %v2867_v50 = vld [vmem:[#allocation10 + $0x620] ss:$8 sps:$4 sm:$0xff]  }
 0x348   :  { %1494 = vmatprep.subr.bf16.mxu1 %v2812_v51  ;;  %1740 = vmatprep.subr.bf16.mxu0 %v2854_v21  ;;  %v2872_v51 = vld [vmem:[#allocation10 + $0x634] ss:$8 sps:$4 sm:$0xff]  }
 0x34b   :  { %1495 = vmatpush1.bf16.msra.mxu1 %v2810_v52  ;;  %1741 = vmatpush1.bf16.msra.mxu0 %v2852_v22  ;;  %v2870_v52 = vld [vmem:[#allocation10 + $0x630] ss:$8 sps:$4 sm:$0xff]  }
 0x34c   :  { %1742 = vmatprep.subr.bf16.mxu0 %v2857_v41  ;;  %1958 = vmatprep.subr.bf16.mxu1 %v2863_v46  ;;  %v2923_v41 = vld [vmem:[#allocation10 + $0x744] ss:$8 sps:$4 sm:$0xff]   ;;  %v2927_v46 = vld [vmem:[#allocation10 + $0x760] ss:$8 sps:$4 sm:$0xff]  }
 0x34f   :  { %1743 = vmatpush1.bf16.msra.mxu0 %v2855_v42  ;;  %v2921_v42 = vld [vmem:[#allocation10 + $0x740] ss:$8 sps:$4 sm:$0xff]  }
 0x350   :  { %1744 = vmatprep.subr.bf16.mxu0 %v2860_v43  ;;  %v2926_v43 = vld [vmem:[#allocation10 + $0x754] ss:$8 sps:$4 sm:$0xff]  }
 0x353   :  { %1745 = vmatpush1.bf16.msra.mxu0 %v2858_v44  ;;  %v2924_v44 = vld [vmem:[#allocation10 + $0x750] ss:$8 sps:$4 sm:$0xff]  }
 0x3e1   :  { %v3309_v23 = vpop.f32.mrb[8].mxu1 }
 0x3e2   :  { %v3311_v0 = vpop.f32.mrb[9].mxu1 }
 0x3e3   :  { %v935_v25 = vpop.f32.mrb[10].mxu1 }
 0x3e4   :  { %v936_v26 = vpop.f32.mrb[11].mxu1 }
 0x3e9   :  { %v1248_v29 = vpop.f32.mrb[8].mxu0 }
 0x3ea   :  { %v1249_v30 = vadd.f32 %v1248_v29, %v1049_v27  ;;  %v1250_v31 = vpop.f32.mrb[9].mxu0 }
 0x3eb   :  { %v1251_v32 = vadd.f32 %v1250_v31, %v1053_v28  ;;  %v1252_v33 = vpop.f32.mrb[10].mxu0 }
 0x3ec   :  { %vm1255_vm10 = vcmp.gt.f32.partialorder %v1249_v30, 0.0  ;;  %v1257_v34 = vmul.f32 0.2, %v1249_v30  ;;  %v1253_v35 = vpop.f32.mrb[11].mxu0  ;;  %v2908_v33 = vld [vmem:[#allocation10 + $0x6f4] ss:$8 sps:$4 sm:$0xff]  }
 0x3ed   :  { %vm1256_vm11 = vcmp.gt.f32.partialorder %v1251_v32, 0.0  ;;  %v1258_v36 = vmul.f32 0.2, %v1251_v32  ;;  %v2914_v35 = vld [vmem:[#allocation10 + $0x714] ss:$8 sps:$4 sm:$0xff]  }
 0x3ee   :  { %v1259_v37 = vsel %vm1255_vm10, %v1249_v30, %v1257_v34  ;;  %v2911_v34 = vld [vmem:[#allocation10 + $0x704] ss:$8 sps:$4 sm:$0xff]  }
 0x3ef   :  { %v1260_v38 = vsel %vm1256_vm11, %v1251_v32, %v1258_v36  ;;  %v1294_v40 = vpack.c.bf16 %v1259_v37, %v1259_v37  ;;  %2208 = vmatprep.subr.bf16.mxu0 %v2911_v34  ;;  %v2912_v36 = vld [vmem:[#allocation10 + $0x710] ss:$8 sps:$4 sm:$0xff]   ;;  %v2917_v37 = vld [vmem:[#allocation10 + $0x724] ss:$8 sps:$4 sm:$0xff]  }
 0x3f0   :  { %v1295_v39 = vpack.c.bf16 %v1260_v38, %v1260_v38  ;;  %v2915_v38 = vld [vmem:[#allocation10 + $0x720] ss:$8 sps:$4 sm:$0xff]  }
 0x3f2   :  { %1496 = vmatprep.mubr.bf16.mxu1 %v1295_v39  ;;  %v2920_v39 = vld [vmem:[#allocation10 + $0x734] ss:$8 sps:$4 sm:$0xff]  }
 0x3f3   :  { %1497 = vmatmul.mubr.bf16.vlgmr.msra.gmra.mrb[12].mxu1 %v1294_v40  ;;  %v2918_v40 = vld [vmem:[#allocation10 + $0x730] ss:$8 sps:$4 sm:$0xff]  }
 0x3f4   :  { %1959 = vmatpush1.bf16.msra.mxu1 %v2861_v45  ;;  %v2929_v45 = vld [vmem:[#allocation10 + $0x764] ss:$8 sps:$4 sm:$0xff]  }
 0x3f5   :  { %1960 = vmatprep.subr.bf16.mxu1 %v2866_v47  ;;  %v2932_v47 = vld [vmem:[#allocation10 + $0x774] ss:$8 sps:$4 sm:$0xff]  }
 0x3f8   :  { %1961 = vmatpush1.bf16.msra.mxu1 %v2864_v48  ;;  %v2930_v48 = vld [vmem:[#allocation10 + $0x770] ss:$8 sps:$4 sm:$0xff]  }
 0x3f9   :  { %1962 = vmatprep.subr.bf16.mxu1 %v2869_v49  ;;  %v2935_v49 = vld [vmem:[#allocation10 + $0x784] ss:$8 sps:$4 sm:$0xff]  }
 0x3fc   :  { %1963 = vmatpush1.bf16.msra.mxu1 %v2867_v50  ;;  %v2933_v50 = vld [vmem:[#allocation10 + $0x780] ss:$8 sps:$4 sm:$0xff]  }
 0x3fd   :  { %1964 = vmatprep.subr.bf16.mxu1 %v2872_v51  ;;  %v2938_v51 = vld [vmem:[#allocation10 + $0x794] ss:$8 sps:$4 sm:$0xff]  }
 0x400   :  { %1965 = vmatpush1.bf16.msra.mxu1 %v2870_v52  ;;  %v2936_v52 = vld [vmem:[#allocation10 + $0x790] ss:$8 sps:$4 sm:$0xff]  }
 0x401   :  { %1966 = vmatprep.subr.bf16.mxu1 %v2875_v53  ;;  %v2941_v53 = vld [vmem:[#allocation10 + $0x7a4] ss:$8 sps:$4 sm:$0xff]  }
 0x404   :  { %1967 = vmatpush1.bf16.msra.mxu1 %v2873_v54  ;;  %v2939_v54 = vld [vmem:[#allocation10 + $0x7a0] ss:$8 sps:$4 sm:$0xff]  }
 0x405   :  { %1968 = vmatprep.subr.bf16.mxu1 %v2878_v55  ;;  %v2944_v55 = vld [vmem:[#allocation10 + $0x7b4] ss:$8 sps:$4 sm:$0xff]  }
 0x408   :  { %1969 = vmatpush1.bf16.msra.mxu1 %v2876_v57  ;;  %v2942_v57 = vld [vmem:[#allocation10 + $0x7b0] ss:$8 sps:$4 sm:$0xff]  }
 0x409   :  { %1970 = vmatprep.subr.bf16.mxu1 %v2881_v58  ;;  %v2947_v58 = vld [vmem:[#allocation10 + $0x7c4] ss:$8 sps:$4 sm:$0xff]  }
 0x40c   :  { %1971 = vmatpush1.bf16.msra.mxu1 %v2879_v59  ;;  %v2945_v59 = vld [vmem:[#allocation10 + $0x7c0] ss:$8 sps:$4 sm:$0xff]  }
 0x40d   :  { %1972 = vmatprep.subr.bf16.mxu1 %v2884_v60  ;;  %v2950_v60 = vld [vmem:[#allocation10 + $0x7d4] ss:$8 sps:$4 sm:$0xff]  }
 0x410   :  { %1973 = vmatpush1.bf16.msra.mxu1 %v2882_v61  ;;  %v2948_v61 = vld [vmem:[#allocation10 + $0x7d0] ss:$8 sps:$4 sm:$0xff]  }
 0x411   :  { %1974 = vmatprep.subr.bf16.mxu1 %v2887_v62  ;;  %v731_v62 = vsub.s32 3, %v3282_v5 }
 0x414   :  { %1975 = vmatpush1.bf16.msra.mxu1 %v2885_v63  ;;  %v1548_v63 = vsub.s32 7, %v3282_v5  ;;  %v2953_v5 = vld [vmem:[#allocation10 + $0x7e4] ss:$8 sps:$4 sm:$0xff]  }
 0x415   :  { %1976 = vmatprep.subr.bf16.mxu1 %v2890_v1  ;;  %v2957_v1 = vld [vmem:[#allocation11] sm:$0xff] }
 0x418   :  { %1977 = vmatpush1.bf16.msra.mxu1 %v2888_v2  ;;  %v732_v2 = vrot.slane %v2957_v1, %v731_v62 }
 0x419   :  { %1978 = vmatprep.subr.bf16.mxu1 %v2893_v3  ;;  %v1549_v3 = vrot.slane %v2957_v1, %v1548_v63 }
 0x41c   :  { %1979 = vmatpush1.bf16.msra.mxu1 %v2891_v4  ;;  %v2958_v4 = vld [vmem:[#allocation11 + $0x8] sm:$0xff] }
 0x41d   :  { %1980 = vmatprep.subr.bf16.mxu1 %v2896_v9  ;;  %v736_v9 = vrot.slane %v2958_v4, %v731_v62 }
 0x420   :  { %1981 = vmatpush1.bf16.msra.mxu1 %v2894_v10  ;;  %v1553_v10 = vrot.slane %v2958_v4, %v1548_v63 }
 0x421   :  { %1982 = vmatprep.subr.bf16.mxu1 %v2899_v11 }
 0x424   :  { %1983 = vmatpush1.bf16.msra.mxu1 %v2897_v12  ;;  %v932_v12 = vadd.f32 %v3309_v23, %v732_v2  ;;  %v108_v23 = vld [vmem:[#allocation11 + $0x10] sm:$0x3] }
 0x425   :  { %1984 = vmatprep.subr.bf16.mxu1 %v2902_v13 }
 0x428   :  { %1985 = vmatpush1.bf16.msra.mxu1 %v2900_v14 }
 0x429   :  { %1986 = vmatprep.subr.bf16.mxu1 %v2905_v15  ;;  %v934_v15 = vadd.f32 %v3311_v0, %v736_v9 }
 0x42c   :  { %1987 = vmatpush1.bf16.msra.mxu1 %v2903_v16 }
 0x42d   :  { %1988 = vmatprep.subr.bf16.mxu1 %v2908_v33 }
 0x430   :  { %1989 = vmatpush1.bf16.msra.mxu1 %v2906_v7 }
 0x4c6   :  { %v1498_v20 = vpop.f32.mrb[12].mxu1 }
 0x4c7   :  { %v1499_v21 = vadd.f32 %v1498_v20, %v1299_v18  ;;  %v1500_v22 = vpop.f32.mrb[13].mxu1 }
 0x4c8   :  { %v1501_v24 = vadd.f32 %v1500_v22, %v1303_v19  ;;  %v1502_v25 = vpop.f32.mrb[14].mxu1  ;;  %v2956_v22 = vld [vmem:[#allocation10 + $0x7f4] ss:$8 sps:$4 sm:$0xff]  }
 0x4c9   :  { %vm1505_vm12 = vcmp.gt.f32.partialorder %v1499_v21, 0.0  ;;  %v1507_v26 = vmul.f32 0.2, %v1499_v21  ;;  %v1503_v27 = vpop.f32.mrb[15].mxu1  ;;  %v109_v25 = vld [vmem:[#allocation11 + $0x18] sm:$0x3] }
 0x4ca   :  { %vm1506_vm13 = vcmp.gt.f32.partialorder %v1501_v24, 0.0  ;;  %v1508_v28 = vmul.f32 0.2, %v1501_v24  ;;  %v1797_v0 = vrot.slane %v109_v25, %v3285_v6 }
 0x4cb   :  { %v1509_v29 = vsel %vm1505_vm12, %v1499_v21, %v1507_v26  ;;  %v2951_v21 = vld [vmem:[#allocation10 + $0x7e0] ss:$8 sps:$4 sm:$0xff]   ;;  %v1793_v26 = vrot.slane %v108_v23, %v3285_v6  ;;  %v2047_v6 = vrot.slane %v109_v25, %v3296_v56 }
 0x4cc   :  { %v1510_v30 = vsel %vm1506_vm13, %v1501_v24, %v1508_v28  ;;  %v1544_v32 = vpack.c.bf16 %v1509_v29, %v1509_v29  ;;  %v2954_v24 = vld [vmem:[#allocation10 + $0x7f0] ss:$8 sps:$4 sm:$0xff]  }
 0x4cd   :  { %v1545_v31 = vpack.c.bf16 %v1510_v30, %v1510_v30 }
 0x4cf   :  { %1746 = vmatprep.mubr.bf16.mxu0 %v1545_v31 }
 0x4d0   :  { %1747 = vmatmul.mubr.bf16.vlgmr.msra.gmra.mrb[12].mxu0 %v1544_v32 }
 0x4d1   :  { %2209 = vmatpush1.bf16.msra.mxu0 %v2909_v8 }
 0x4d2   :  { %2210 = vmatprep.subr.bf16.mxu0 %v2914_v35 }
 0x4d5   :  { %2211 = vmatpush1.bf16.msra.mxu0 %v2912_v36 }
 0x4d6   :  { %2212 = vmatprep.subr.bf16.mxu0 %v2917_v37 }
 0x4d9   :  { %2213 = vmatpush1.bf16.msra.mxu0 %v2915_v38 }
 0x4da   :  { %2214 = vmatprep.subr.bf16.mxu0 %v2920_v39  ;;  %v2043_v39 = vrot.slane %v108_v23, %v3296_v56 }
 0x4dd   :  { %2215 = vmatpush1.bf16.msra.mxu0 %v2918_v40 }
 0x4de   :  { %2216 = vmatprep.subr.bf16.mxu0 %v2923_v41 }
 0x4e1   :  { %2217 = vmatpush1.bf16.msra.mxu0 %v2921_v42 }
 0x4e2   :  { %2218 = vmatprep.subr.bf16.mxu0 %v2926_v43 }
 0x4e5   :  { %2219 = vmatpush1.bf16.msra.mxu0 %v2924_v44 }
 0x4e6   :  { %2220 = vmatprep.subr.bf16.mxu0 %v2929_v45 }
 0x4e9   :  { %2221 = vmatpush1.bf16.msra.mxu0 %v2927_v46 }
 0x4ea   :  { %2222 = vmatprep.subr.bf16.mxu0 %v2932_v47 }
 0x4ed   :  { %2223 = vmatpush1.bf16.msra.mxu0 %v2930_v48 }
 0x4ee   :  { %2224 = vmatprep.subr.bf16.mxu0 %v2935_v49 }
 0x4f1   :  { %2225 = vmatpush1.bf16.msra.mxu0 %v2933_v50 }
 0x4f2   :  { %2226 = vmatprep.subr.bf16.mxu0 %v2938_v51 }
 0x4f5   :  { %2227 = vmatpush1.bf16.msra.mxu0 %v2936_v52 }
 0x4f6   :  { %2228 = vmatprep.subr.bf16.mxu0 %v2941_v53 }
 0x4f9   :  { %2229 = vmatpush1.bf16.msra.mxu0 %v2939_v54 }
 0x4fa   :  { %2230 = vmatprep.subr.bf16.mxu0 %v2944_v55 }
 0x4fd   :  { %2231 = vmatpush1.bf16.msra.mxu0 %v2942_v57 }
 0x4fe   :  { %2232 = vmatprep.subr.bf16.mxu0 %v2947_v58 }
 0x501   :  { %2233 = vmatpush1.bf16.msra.mxu0 %v2945_v59 }
 0x502   :  { %2234 = vmatprep.subr.bf16.mxu0 %v2950_v60 }
 0x505   :  { %2235 = vmatpush1.bf16.msra.mxu0 %v2948_v61 }
 0x506   :  { %2236 = vmatprep.subr.bf16.mxu0 %v2953_v5 }
 0x509   :  { %2237 = vmatpush1.bf16.msra.mxu0 %v2951_v21 }
 0x50a   :  { %2238 = vmatprep.subr.bf16.mxu0 %v2956_v22 }
 0x50d   :  { %2239 = vmatpush1.bf16.msra.mxu0 %v2954_v24 }
 0x5a3   :  { %v1748_v11 = vpop.f32.mrb[12].mxu0 }
 0x5a4   :  { %v1749_v13 = vadd.f32 %v1748_v11, %v1549_v3  ;;  %v1750_v14 = vpop.f32.mrb[13].mxu0 }
 0x5a5   :  { %v1751_v16 = vadd.f32 %v1750_v14, %v1553_v10  ;;  %v1752_v17 = vpop.f32.mrb[14].mxu0 }
 0x5a6   :  { %v1788_v18 = vpack.c.bf16 %v1749_v13, %v932_v12  ;;  %v1753_v19 = vpop.f32.mrb[15].mxu0 }
 0x5a7   :  { %v1789_v20 = vpack.c.bf16 %v1751_v16, %v934_v15 }
 0x5a9   :  { %1990 = vmatprep.mubr.bf16.mxu1 %v1789_v20 }
 0x5aa   :  { %1991 = vmatmul.mubr.bf16.vlgmr.msra.gmra.mrb[16].mxu1 %v1788_v18 }
 0x67d   :  { %v1992_v27 = vpop.f32.mrb[16].mxu1 }
 0x67e   :  { %v1993_v28 = vadd.f32 %v1992_v27, %v1793_v26  ;;  %v1994_v29 = vpop.f32.mrb[17].mxu1 }
 0x67f   :  { %v1995_v30 = vadd.f32 %v1994_v29, %v1797_v0  ;;  %v1996_v31 = vpop.f32.mrb[18].mxu1 }
 0x680   :  { %v1997_v32 = vadd.f32 %v1996_v31, %v1793_v26  ;;  %v1998_v33 = vpop.f32.mrb[19].mxu1  ;;  %v2001_v8 = vmax.f32 %v1993_v28, 0.0 }
 0x681   :  { %v1999_v7 = vadd.f32 %v1998_v33, %v1797_v0  ;;  %v2002_v35 = vmax.f32 %v1995_v30, 0.0 }
 0x682   :  { %v2003_v34 = vmax.f32 %v1997_v32, 0.0 }
 0x683   :  { %v2004_v36 = vmax.f32 %v1999_v7, 0.0 }
 0x684   :  { %v2038_v37 = vpack.c.bf16 %v2003_v34, %v2001_v8 }
 0x685   :  { %v2039_v38 = vpack.c.bf16 %v2004_v36, %v2002_v35 }
 0x687   :  { %2240 = vmatprep.mubr.bf16.mxu0 %v2039_v38 }
 0x688   :  { %2241 = vmatmul.mubr.bf16.vlgmr.msra.gmra.mrb[16].mxu0 %v2038_v37 }
 0x75b   :  { %v2242_v40 = vpop.f32.mrb[16].mxu0 }
 0x75c   :  { %v2243_v41 = vadd.f32 %v2242_v40, %v2043_v39  ;;  %v2244_v42 = vpop.f32.mrb[17].mxu0 }
 0x75d   :  { %v2245_v43 = vadd.f32 %v2244_v42, %v2047_v6  ;;  %v2246_v44 = vpop.f32.mrb[18].mxu0 }
 0x75e   :  { %2251 = vst [vmem:[#allocation13] sm:$0xff] %v2243_v41  ;;  %v2247_v45 = vadd.f32 %v2246_v44, %v2043_v39  ;;  %v2248_v46 = vpop.f32.mrb[19].mxu0 }
 0x75f   :  { %2252 = vst [vmem:[#allocation13 + $0x8] sm:$0xff] %v2245_v43  ;;  %v2249_v47 = vadd.f32 %v2248_v46, %v2047_v6 }
 0x760   :  { %2253 = vst [vmem:[#allocation14] sm:$0xff] %v2247_v45 }
 0x761   :  { %3102 = shalt.err (!%p3099_p10)
}
 0x762   :  { %s3103_s30 = scalar_lea.hbm %s3357_s6, 256 }
 0x763   :  { %p3104_p11 = scmp.ne.s32.totalorder %s3357_s6, %s3103_s30  ;;  %p3107_p12 = scmp.lt.u32.totalorder %s3103_s30, %s3357_s6 }
 0x765   :  { %p3109_p13 = pnand %p3107_p12, %p3104_p11 }
 0x767   :  { %3112 = shalt.err (!%p3109_p13)
}
 0x768   :  { %2264 = dma.vmem_to_hbm [thread:$0]  %s2262_s26, 256, %s3357_s6, [#allocation4]   ;;  %2254 = vst [vmem:[#allocation14 + $0x8] sm:$0xff] %v2249_v47 }
 0x769   :  { %s3113_s3 = scalar_lea.vmem %s2272_s16, 256  ;;  %p3118_p1 = scmp.lt.s32.totalorder %s2272_s16, %s2272_s16 }
 0x76a   :  { %p3114_p0 = scmp.ne.s32.totalorder %s2272_s16, %s3113_s3  ;;  %p3119_p2 = scmp.lt.s32.totalorder %s3113_s3, %s3113_s3 }
 0x76c   :  { %p3120_p3 = por %p3119_p2, %p3118_p1 }
 0x76e   :  { %p3121_p4 = pnand %p3120_p3, %p3114_p0 }
 0x770   :  { %3124 = shalt.err (!%p3121_p4)
}
 0x771   :  { %s3125_s15 = scalar_lea.hbm %s3358_s7, 256 }
 0x772   :  { %p3126_p5 = scmp.ne.s32.totalorder %s3358_s7, %s3125_s15  ;;  %p3129_p6 = scmp.lt.u32.totalorder %s3125_s15, %s3358_s7 }
 0x774   :  { %p3131_p7 = pnand %p3129_p6, %p3126_p5 }
 0x776   :  { %3134 = shalt.err (!%p3131_p7)
}
 0x777   :  { %2274 = dma.vmem_to_hbm [thread:$0]  %s2272_s16, 256, %s3358_s7, [#allocation15]  }
 0x778   :  { %3143 = dma.done.wait [#allocation4], 256  }
 0x779   :  { %3144 = vsyncadd [#allocation4], 4294967040 }
 0x77a   :  { %3145 = dma.done.wait [#allocation15], 256  }
 0x77b   :  { %3146 = vsyncadd [#allocation15], 4294967040 }
 0x77c   :  { %2281 = vsyncpa [#allocation3], 1 }
 0x77d   :  { %2282 = vsyncpa [#allocation6], 1 }
 0x77e   :  { %2283 = vsyncpa [#allocation9], 1 }
 0x77f   :  { %2284 = vsyncpa [#allocation12], 1 }
 0x780   :  { %2285 = vsyncpa [#allocation4], 1 }
 0x781   :  { %2286 = vsyncpa [#allocation15], 1 }

</bundles_post_ra>
